<compile_context>
chip_gen: v6e
topology: v6e:2x2x1
jax: 0.10.0
libtpu: 0.0.40
codegen_flags: <defaults>
</compile_context>

<pallas_src>
import jax
import jax.numpy as jnp
from jax import lax
from jax.experimental import pallas as pl
from jax.experimental.pallas import tpu as pltpu

KSIZE = 4
EPS = 1e-5
NEG_SLOPE = 0.2
TM_MAX = 256                       # M-tile size (rows of the im2col matmul)
VMEM_LIMIT = 32 * 1024 * 1024      # fits v5e/v6e/v7x scoped-VMEM budgets


def _round_up(x, mult):
    return ((x + mult - 1) // mult) * mult


# ---------------------------------------------------------------------------
# Pass 1 kernel: tiled matmul + bias (+ optional LeakyReLU) (+ optional stats)
# ---------------------------------------------------------------------------
def _make_conv_kernel(apply_act, collect_stats, tm, m_actual, m_padded):
    mask_needed = collect_stats and (m_padded != m_actual)

    def kernel(a_ref, w_ref, b_ref, *out_refs):
        if collect_stats:
            y_ref, sum_ref, ssq_ref = out_refs
        else:
            (y_ref,) = out_refs

        # (TM, Kp) @ (Kp, Cp) on the MXU, bf16 inputs, f32 accumulation.
        y = jnp.dot(a_ref[...], w_ref[...],
                    preferred_element_type=jnp.float32)
        y = y + b_ref[...]                      # (1, Cp) broadcasts
        if apply_act:
            y = jnp.where(y > 0, y, NEG_SLOPE * y)
        y_ref[...] = y.astype(y_ref.dtype)

        if collect_stats:
            m_idx = pl.program_id(1)

            @pl.when(m_idx == 0)
            def _():
                sum_ref[...] = jnp.zeros_like(sum_ref)
                ssq_ref[...] = jnp.zeros_like(ssq_ref)

            if mask_needed:
                rows = m_idx * tm + lax.broadcasted_iota(
                    jnp.int32, (tm, 1), 0)
                yc = jnp.where(rows < m_actual, y, 0.0)
            else:
                yc = y
            sum_ref[...] += jnp.sum(yc, axis=0, keepdims=True)
            ssq_ref[...] += jnp.sum(yc * yc, axis=0, keepdims=True)

    return kernel


# ---------------------------------------------------------------------------
# Pass 2 kernel: InstanceNorm (from precomputed stats) + LeakyReLU
# ---------------------------------------------------------------------------
def _make_norm_act_kernel(m_actual, apply_act):
    inv_m = 1.0 / float(m_actual)

    def kernel(y_ref, sum_ref, ssq_ref, o_ref):
        y = y_ref[...]                               # (TM, Cp) f32
        mean = sum_ref[...] * inv_m                  # (1, Cp)
        var = jnp.maximum(ssq_ref[...] * inv_m - mean * mean, 0.0)
        yn = (y - mean) * lax.rsqrt(var + EPS)       # EUP rsqrt
        if apply_act:
            yn = jnp.where(yn > 0, yn, NEG_SLOPE * yn)
        o_ref[...] = yn.astype(o_ref.dtype)

    return kernel


# ---------------------------------------------------------------------------
# Glue: im2col (strided slicing / stacking only, no arithmetic)
# ---------------------------------------------------------------------------
def _im2col(x_nhwc, kh, kw, stride, pad):
    x = jnp.pad(x_nhwc, ((0, 0), (pad, pad), (pad, pad), (0, 0)))
    n, h, w, c = x.shape
    oh = (h - kh) // stride + 1
    ow = (w - kw) // stride + 1
    patches = []
    for i in range(kh):
        for j in range(kw):
            patches.append(
                x[:, i:i + stride * oh:stride, j:j + stride * ow:stride, :])
    p = jnp.stack(patches, axis=3)               # (N, OH, OW, KH*KW, C)
    a = p.reshape(n, oh * ow, kh * kw * c)       # (N, M, K)
    return a, oh, ow


# ---------------------------------------------------------------------------
# One conv layer: conv(+bias) [+ InstanceNorm] [+ LeakyReLU]
# ---------------------------------------------------------------------------
def _conv_layer(x_nhwc, w_oihw, b, stride, apply_norm, apply_act):
    n = x_nhwc.shape[0]
    cout = w_oihw.shape[0]
    a, oh, ow = _im2col(x_nhwc, KSIZE, KSIZE, stride, 1)
    m = oh * ow
    k = a.shape[-1]

    kp = _round_up(k, 128)                 # MXU-friendly contraction dim
    cp = _round_up(cout, 128)              # lane-dense output
    tm = m if m <= TM_MAX else TM_MAX
    m_pad = _round_up(m, tm)
    num_m = m_pad // tm

    # bf16 matmul operands (f32 accumulation inside the kernel).
    a = jnp.pad(a, ((0, 0), (0, m_pad - m), (0, kp - k))).astype(jnp.bfloat16)
    wm = jnp.transpose(w_oihw, (2, 3, 1, 0)).reshape(k, cout)
    wm = jnp.pad(wm, ((0, kp - k), (0, cp - cout))).astype(jnp.bfloat16)
    bp = jnp.pad(b, (0, cp - cout)).reshape(1, cp).astype(jnp.float32)

    grid = (n, num_m)
    a_spec = pl.BlockSpec((None, tm, kp), lambda i, j: (i, j, 0))
    w_spec = pl.BlockSpec((kp, cp), lambda i, j: (0, 0))      # VMEM-resident
    b_spec = pl.BlockSpec((1, cp), lambda i, j: (0, 0))       # VMEM-resident
    y_spec = pl.BlockSpec((None, tm, cp), lambda i, j: (i, j, 0))
    stat_spec = pl.BlockSpec((None, 1, cp), lambda i, j: (i, 0, 0))

    conv_cost = pl.CostEstimate(
        flops=2 * n * m_pad * kp * cp,
        transcendentals=0,
        bytes_accessed=(n * m_pad * kp * 2 + kp * cp * 2
                        + n * m_pad * cp * 4))

    if apply_norm:
        out_shape = (
            jax.ShapeDtypeStruct((n, m_pad, cp), jnp.float32),  # pre-norm y
            jax.ShapeDtypeStruct((n, 1, cp), jnp.float32),      # sum
            jax.ShapeDtypeStruct((n, 1, cp), jnp.float32),      # sum of sq
        )
        out_specs = (y_spec, stat_spec, stat_spec)
        dims = ("parallel", "arbitrary")   # stats accumulate across M tiles
    else:
        out_shape = jax.ShapeDtypeStruct((n, m_pad, cp), jnp.float32)
        out_specs = y_spec
        dims = ("parallel", "parallel")

    conv_out = pl.pallas_call(
        _make_conv_kernel(apply_act and not apply_norm, apply_norm,
                          tm, m, m_pad),
        grid=grid,
        in_specs=[a_spec, w_spec, b_spec],
        out_specs=out_specs,
        out_shape=out_shape,
        compiler_params=pltpu.CompilerParams(
            dimension_semantics=dims, vmem_limit_bytes=VMEM_LIMIT),
        cost_estimate=conv_cost,
    )(a, wm, bp)

    if apply_norm:
        y, s, q = conv_out
        y = pl.pallas_call(
            _make_norm_act_kernel(m, apply_act),
            grid=grid,
            in_specs=[y_spec, stat_spec, stat_spec],
            out_specs=y_spec,
            out_shape=jax.ShapeDtypeStruct((n, m_pad, cp), jnp.float32),
            compiler_params=pltpu.CompilerParams(
                dimension_semantics=("parallel", "parallel"),
                vmem_limit_bytes=VMEM_LIMIT),
            cost_estimate=pl.CostEstimate(
                flops=6 * n * m_pad * cp,
                transcendentals=n * num_m * cp,
                bytes_accessed=2 * n * m_pad * cp * 4),
        )(y, s, q)
    else:
        y = conv_out

    # Strip M / channel padding and restore NHWC.
    y = y[:, :m, :cout]
    return y.reshape(n, oh, ow, cout)


# ---------------------------------------------------------------------------
# Discriminator forward (NCHW in / NCHW out, like the PyTorch module)
# ---------------------------------------------------------------------------
def discriminator_forward(x_nchw, params):
    x = jnp.transpose(x_nchw, (0, 2, 3, 1))  # NCHW -> NHWC
    x = _conv_layer(x, params["w1"], params["b1"], 2, False, True)
    x = _conv_layer(x, params["w2"], params["b2"], 2, True, True)
    x = _conv_layer(x, params["w3"], params["b3"], 2, True, True)
    x = _conv_layer(x, params["w4"], params["b4"], 2, True, True)
    x = _conv_layer(x, params["w5"], params["b5"], 1, False, False)
    return jnp.transpose(x, (0, 3, 1, 2))    # NHWC -> NCHW


# ---------------------------------------------------------------------------
# Pure-JAX reference (same dtype policy: bf16 matmul inputs, f32 accumulation,
# f32 epilogue) for the correctness check.
# ---------------------------------------------------------------------------
def _ref_forward(x, params):
    def conv(x, w, b, stride):
        y = lax.conv_general_dilated(
            x.astype(jnp.bfloat16), w.astype(jnp.bfloat16),
            window_strides=(stride, stride),
            padding=[(1, 1), (1, 1)],
            dimension_numbers=("NCHW", "OIHW", "NCHW"),
            preferred_element_type=jnp.float32)
        return y + b[None, :, None, None].astype(jnp.float32)

    def inorm(x):
        mean = jnp.mean(x, axis=(2, 3), keepdims=True)
        var = jnp.mean((x - mean) ** 2, axis=(2, 3), keepdims=True)
        return (x - mean) * lax.rsqrt(var + EPS)

    def lrelu(x):
        return jnp.where(x > 0, x, NEG_SLOPE * x)

    y = lrelu(conv(x, params["w1"], params["b1"], 2))
    y = lrelu(inorm(conv(y, params["w2"], params["b2"], 2)))
    y = lrelu(inorm(conv(y, params["w3"], params["b3"], 2)))
    y = lrelu(inorm(conv(y, params["w4"], params["b4"], 2)))
    y = conv(y, params["w5"], params["b5"], 1)
    return y


# ---------------------------------------------------------------------------
# Deterministic parameter init (PyTorch-like uniform(-1/sqrt(fan_in), +))
# ---------------------------------------------------------------------------
def _init_conv(key, cout, cin, k=KSIZE):
    kw_, kb_ = jax.random.split(key)
    bound = 1.0 / (cin * k * k) ** 0.5
    w = jax.random.uniform(kw_, (cout, cin, k, k), jnp.float32, -bound, bound)
    b = jax.random.uniform(kb_, (cout,), jnp.float32, -bound, bound)
    return w, b


def init_params(key, in_ch, n_filter):
    keys = jax.random.split(key, 5)
    dims = [(n_filter, in_ch),
            (n_filter * 2, n_filter),
            (n_filter * 4, n_filter * 2),
            (n_filter * 8, n_filter * 4),
            (1, n_filter * 8)]
    params = {}
    for idx, (k, (co, ci)) in enumerate(zip(keys, dims), start=1):
        w, b = _init_conv(k, co, ci)
        params[f"w{idx}"] = w
        params[f"b{idx}"] = b
    return params


if __name__ == "__main__":
    key = jax.random.PRNGKey(0)
    k_param, k_x = jax.random.split(key)

    in_ch, n_filter = 3, 8          # small synthetic config
    # Spatial 32 so that the final stride-1 4x4 conv still has a valid output.
    x = jax.random.normal(k_x, (2, in_ch, 32, 32), jnp.float32)
    params = init_params(k_param, in_ch, n_filter)

    fwd = jax.jit(discriminator_forward)
    out = jax.block_until_ready(fwd(x, params))

    ref = _ref_forward(x, params)
    assert out.shape == ref.shape == (2, 1, 1, 1), out.shape
    max_diff = float(jnp.max(jnp.abs(out - ref)))
    assert max_diff < 2e-2, f"mismatch vs reference: {max_diff}"

    print("KERNEL_OK")
</pallas_src>

<mosaic_0001>
module attributes {stable_mosaic.version = 11 : i64} {
  func.func @kernel(%arg0: i32, %arg1: i32, %arg2: memref<1x256x128xbf16, #tpu.memory_space<vmem>>, %arg3: memref<128x128xbf16, #tpu.memory_space<vmem>>, %arg4: memref<1x128xf32, #tpu.memory_space<vmem>>, %arg5: memref<1x256x128xf32, #tpu.memory_space<vmem>>) attributes {dimension_semantics = [#tpu.dimension_semantics<parallel>, #tpu.dimension_semantics<parallel>], iteration_bounds = array<i64: 2, 1>, scalar_prefetch = 0 : i64, scratch_operands = 0 : i64, tpu.core_type = #tpu.core_type<tc>, window_params = [{transform_indices = @transform_0, window_bounds = array<i64: 1, 256, 128>}, {pipeline_mode = #tpu.pipeline_mode<synchronous>, transform_indices = @transform_1, window_bounds = array<i64: 128, 128>}, {pipeline_mode = #tpu.pipeline_mode<synchronous>, transform_indices = @transform_2, window_bounds = array<i64: 1, 128>}, {transform_indices = @transform_3, window_bounds = array<i64: 1, 256, 128>}]} {
    %c0 = arith.constant 0 : index
    %c0_0 = arith.constant 0 : index
    %c0_1 = arith.constant 0 : index
    %0 = vector.load %arg2[%c0, %c0_0, %c0_1] : memref<1x256x128xbf16, #tpu.memory_space<vmem>>, vector<1x256x128xbf16>
    %1 = vector.shape_cast %0 : vector<1x256x128xbf16> to vector<256x128xbf16>
    %c0_2 = arith.constant 0 : index
    %c0_3 = arith.constant 0 : index
    %2 = vector.load %arg3[%c0_2, %c0_3] : memref<128x128xbf16, #tpu.memory_space<vmem>>, vector<128x128xbf16>
    %cst = arith.constant dense<0.000000e+00> : vector<256x128xf32>
    %3 = tpu.matmul %1, %2, %cst {dimension_numbers = #tpu.dot_dimension_numbers<[1], [0], [0], [1], [0, 0, 1, 1], [], []>} : vector<256x128xbf16>, vector<128x128xbf16>, vector<256x128xf32> -> vector<256x128xf32>
    %c0_4 = arith.constant 0 : index
    %c0_5 = arith.constant 0 : index
    %4 = vector.load %arg4[%c0_4, %c0_5] : memref<1x128xf32, #tpu.memory_space<vmem>>, vector<1x128xf32>
    %5 = vector.broadcast %4 : vector<1x128xf32> to vector<256x128xf32>
    %6 = arith.addf %3, %5 : vector<256x128xf32>
    %cst_6 = arith.constant 0.000000e+00 : f32
    %7 = vector.broadcast %cst_6 : f32 to vector<256x128xf32>
    %8 = arith.cmpf ogt, %6, %7 : vector<256x128xf32>
    %cst_7 = arith.constant 2.000000e-01 : f32
    %9 = vector.broadcast %cst_7 : f32 to vector<256x128xf32>
    %10 = arith.mulf %9, %6 : vector<256x128xf32>
    %11 = arith.select %8, %6, %10 : vector<256x128xi1>, vector<256x128xf32>
    %c0_8 = arith.constant 0 : index
    %c0_9 = arith.constant 0 : index
    %c0_10 = arith.constant 0 : index
    %12 = vector.load %arg5[%c0_8, %c0_9, %c0_10] : memref<1x256x128xf32, #tpu.memory_space<vmem>>, vector<1x256x128xf32>
    %13 = vector.shape_cast %12 : vector<1x256x128xf32> to vector<256x128xf32>
    %14 = vector.shape_cast %11 : vector<256x128xf32> to vector<1x256x128xf32>
    tpu.vector_store %arg5[%c0_8, %c0_9, %c0_10], %14 {strides = array<i32>} : memref<1x256x128xf32, #tpu.memory_space<vmem>>, vector<1x256x128xf32>,
    return
  }
  func.func @transform_0(%arg0: i32, %arg1: i32) -> (i32, i32, i32) {
    %c0_i32 = arith.constant 0 : i32
    %c0_i32_0 = arith.constant 0 : i32
    return %arg0, %arg1, %c0_i32 : i32, i32, i32
  }
  func.func @transform_1(%arg0: i32, %arg1: i32) -> (i32, i32) {
    %c0_i32 = arith.constant 0 : i32
    %c0_i32_0 = arith.constant 0 : i32
    %c0_i32_1 = arith.constant 0 : i32
    return %c0_i32, %c0_i32_0 : i32, i32
  }
  func.func @transform_2(%arg0: i32, %arg1: i32) -> (i32, i32) {
    %c0_i32 = arith.constant 0 : i32
    %c0_i32_0 = arith.constant 0 : i32
    %c0_i32_1 = arith.constant 0 : i32
    return %c0_i32, %c0_i32_0 : i32, i32
  }
  func.func @transform_3(%arg0: i32, %arg1: i32) -> (i32, i32, i32) {
    %c0_i32 = arith.constant 0 : i32
    %c0_i32_0 = arith.constant 0 : i32
    return %arg0, %arg1, %c0_i32 : i32, i32, i32
  }
}

module attributes {stable_mosaic.version = 11 : i64} {
  func.func @kernel(%arg0: i32, %arg1: i32, %arg2: memref<1x64x128xbf16, #tpu.memory_space<vmem>>, %arg3: memref<128x128xbf16, #tpu.memory_space<vmem>>, %arg4: memref<1x128xf32, #tpu.memory_space<vmem>>, %arg5: memref<1x64x128xf32, #tpu.memory_space<vmem>>, %arg6: memref<1x1x128xf32, #tpu.memory_space<vmem>>, %arg7: memref<1x1x128xf32, #tpu.memory_space<vmem>>) attributes {dimension_semantics = [#tpu.dimension_semantics<parallel>, #tpu.dimension_semantics<arbitrary>], iteration_bounds = array<i64: 2, 1>, scalar_prefetch = 0 : i64, scratch_operands = 0 : i64, tpu.core_type = #tpu.core_type<tc>, window_params = [{transform_indices = @transform_0, window_bounds = array<i64: 1, 64, 128>}, {pipeline_mode = #tpu.pipeline_mode<synchronous>, transform_indices = @transform_1, window_bounds = array<i64: 128, 128>}, {pipeline_mode = #tpu.pipeline_mode<synchronous>, transform_indices = @transform_2, window_bounds = array<i64: 1, 128>}, {transform_indices = @transform_3, window_bounds = array<i64: 1, 64, 128>}, {transform_indices = @transform_4, window_bounds = array<i64: 1, 1, 128>}, {transform_indices = @transform_5, window_bounds = array<i64: 1, 1, 128>}]} {
    %c0 = arith.constant 0 : index
    %c0_0 = arith.constant 0 : index
    %c0_1 = arith.constant 0 : index
    %0 = vector.load %arg2[%c0, %c0_0, %c0_1] : memref<1x64x128xbf16, #tpu.memory_space<vmem>>, vector<1x64x128xbf16>
    %1 = vector.shape_cast %0 : vector<1x64x128xbf16> to vector<64x128xbf16>
    %c0_2 = arith.constant 0 : index
    %c0_3 = arith.constant 0 : index
    %2 = vector.load %arg3[%c0_2, %c0_3] : memref<128x128xbf16, #tpu.memory_space<vmem>>, vector<128x128xbf16>
    %cst = arith.constant dense<0.000000e+00> : vector<64x128xf32>
    %3 = tpu.matmul %1, %2, %cst {dimension_numbers = #tpu.dot_dimension_numbers<[1], [0], [0], [1], [0, 0, 1, 1], [], []>} : vector<64x128xbf16>, vector<128x128xbf16>, vector<64x128xf32> -> vector<64x128xf32>
    %c0_4 = arith.constant 0 : index
    %c0_5 = arith.constant 0 : index
    %4 = vector.load %arg4[%c0_4, %c0_5] : memref<1x128xf32, #tpu.memory_space<vmem>>, vector<1x128xf32>
    %5 = vector.broadcast %4 : vector<1x128xf32> to vector<64x128xf32>
    %6 = arith.addf %3, %5 : vector<64x128xf32>
    %c0_6 = arith.constant 0 : index
    %c0_7 = arith.constant 0 : index
    %c0_8 = arith.constant 0 : index
    %7 = vector.load %arg5[%c0_6, %c0_7, %c0_8] : memref<1x64x128xf32, #tpu.memory_space<vmem>>, vector<1x64x128xf32>
    %8 = vector.shape_cast %7 : vector<1x64x128xf32> to vector<64x128xf32>
    %9 = vector.shape_cast %6 : vector<64x128xf32> to vector<1x64x128xf32>
    tpu.vector_store %arg5[%c0_6, %c0_7, %c0_8], %9 {strides = array<i32>} : memref<1x64x128xf32, #tpu.memory_space<vmem>>, vector<1x64x128xf32>,
    %c0_i32 = arith.constant 0 : i32
    %10 = arith.cmpi eq, %arg1, %c0_i32 : i32
    %11 = arith.extui %10 : i1 to i32
    %c0_i32_9 = arith.constant 0 : i32
    %12 = arith.cmpi ne, %11, %c0_i32_9 : i32
    scf.if %12 {
      %cst_24 = arith.constant 0.000000e+00 : f32
      %30 = vector.broadcast %cst_24 : f32 to vector<1x128xf32>
      %c0_25 = arith.constant 0 : index
      %c0_26 = arith.constant 0 : index
      %c0_27 = arith.constant 0 : index
      %31 = vector.load %arg6[%c0_25, %c0_26, %c0_27] : memref<1x1x128xf32, #tpu.memory_space<vmem>>, vector<1x1x128xf32>
      %32 = vector.shape_cast %31 : vector<1x1x128xf32> to vector<1x128xf32>
      %33 = vector.shape_cast %30 : vector<1x128xf32> to vector<1x1x128xf32>
      tpu.vector_store %arg6[%c0_25, %c0_26, %c0_27], %33 {strides = array<i32>} : memref<1x1x128xf32, #tpu.memory_space<vmem>>, vector<1x1x128xf32>,
      %cst_28 = arith.constant 0.000000e+00 : f32
      %34 = vector.broadcast %cst_28 : f32 to vector<1x128xf32>
      %c0_29 = arith.constant 0 : index
      %c0_30 = arith.constant 0 : index
      %c0_31 = arith.constant 0 : index
      %35 = vector.load %arg7[%c0_29, %c0_30, %c0_31] : memref<1x1x128xf32, #tpu.memory_space<vmem>>, vector<1x1x128xf32>
      %36 = vector.shape_cast %35 : vector<1x1x128xf32> to vector<1x128xf32>
      %37 = vector.shape_cast %34 : vector<1x128xf32> to vector<1x1x128xf32>
      tpu.vector_store %arg7[%c0_29, %c0_30, %c0_31], %37 {strides = array<i32>} : memref<1x1x128xf32, #tpu.memory_space<vmem>>, vector<1x1x128xf32>,
    } else {
    }
    %c0_10 = arith.constant 0 : index
    %c0_11 = arith.constant 0 : index
    %c0_12 = arith.constant 0 : index
    %13 = vector.load %arg6[%c0_10, %c0_11, %c0_12] : memref<1x1x128xf32, #tpu.memory_space<vmem>>, vector<1x1x128xf32>
    %14 = vector.shape_cast %13 : vector<1x1x128xf32> to vector<1x128xf32>
    %cst_13 = arith.constant dense<0.000000e+00> : vector<128xf32>
    %15 = vector.multi_reduction <add>, %6, %cst_13 [0] : vector<64x128xf32> to vector<128xf32>
    %16 = vector.shape_cast %15 : vector<128xf32> to vector<1x128xf32>
    %17 = arith.addf %14, %16 : vector<1x128xf32>
    %c0_14 = arith.constant 0 : index
    %c0_15 = arith.constant 0 : index
    %c0_16 = arith.constant 0 : index
    %18 = vector.load %arg6[%c0_14, %c0_15, %c0_16] : memref<1x1x128xf32, #tpu.memory_space<vmem>>, vector<1x1x128xf32>
    %19 = vector.shape_cast %18 : vector<1x1x128xf32> to vector<1x128xf32>
    %20 = vector.shape_cast %17 : vector<1x128xf32> to vector<1x1x128xf32>
    tpu.vector_store %arg6[%c0_14, %c0_15, %c0_16], %20 {strides = array<i32>} : memref<1x1x128xf32, #tpu.memory_space<vmem>>, vector<1x1x128xf32>,
    %c0_17 = arith.constant 0 : index
    %c0_18 = arith.constant 0 : index
    %c0_19 = arith.constant 0 : index
    %21 = vector.load %arg7[%c0_17, %c0_18, %c0_19] : memref<1x1x128xf32, #tpu.memory_space<vmem>>, vector<1x1x128xf32>
    %22 = vector.shape_cast %21 : vector<1x1x128xf32> to vector<1x128xf32>
    %23 = arith.mulf %6, %6 : vector<64x128xf32>
    %cst_20 = arith.constant dense<0.000000e+00> : vector<128xf32>
    %24 = vector.multi_reduction <add>, %23, %cst_20 [0] : vector<64x128xf32> to vector<128xf32>
    %25 = vector.shape_cast %24 : vector<128xf32> to vector<1x128xf32>
    %26 = arith.addf %22, %25 : vector<1x128xf32>
    %c0_21 = arith.constant 0 : index
    %c0_22 = arith.constant 0 : index
    %c0_23 = arith.constant 0 : index
    %27 = vector.load %arg7[%c0_21, %c0_22, %c0_23] : memref<1x1x128xf32, #tpu.memory_space<vmem>>, vector<1x1x128xf32>
    %28 = vector.shape_cast %27 : vector<1x1x128xf32> to vector<1x128xf32>
    %29 = vector.shape_cast %26 : vector<1x128xf32> to vector<1x1x128xf32>
    tpu.vector_store %arg7[%c0_21, %c0_22, %c0_23], %29 {strides = array<i32>} : memref<1x1x128xf32, #tpu.memory_space<vmem>>, vector<1x1x128xf32>,
    return
  }
  func.func @transform_0(%arg0: i32, %arg1: i32) -> (i32, i32, i32) {
    %c0_i32 = arith.constant 0 : i32
    %c0_i32_0 = arith.constant 0 : i32
    return %arg0, %arg1, %c0_i32 : i32, i32, i32
  }
  func.func @transform_1(%arg0: i32, %arg1: i32) -> (i32, i32) {
    %c0_i32 = arith.constant 0 : i32
    %c0_i32_0 = arith.constant 0 : i32
    %c0_i32_1 = arith.constant 0 : i32
    return %c0_i32, %c0_i32_0 : i32, i32
  }
  func.func @transform_2(%arg0: i32, %arg1: i32) -> (i32, i32) {
    %c0_i32 = arith.constant 0 : i32
    %c0_i32_0 = arith.constant 0 : i32
    %c0_i32_1 = arith.constant 0 : i32
    return %c0_i32, %c0_i32_0 : i32, i32
  }
  func.func @transform_3(%arg0: i32, %arg1: i32) -> (i32, i32, i32) {
    %c0_i32 = arith.constant 0 : i32
    %c0_i32_0 = arith.constant 0 : i32
    return %arg0, %arg1, %c0_i32 : i32, i32, i32
  }
  func.func @transform_4(%arg0: i32, %arg1: i32) -> (i32, i32, i32) {
    %c0_i32 = arith.constant 0 : i32
    %c0_i32_0 = arith.constant 0 : i32
    %c0_i32_1 = arith.constant 0 : i32
    return %arg0, %c0_i32, %c0_i32_0 : i32, i32, i32
  }
  func.func @transform_5(%arg0: i32, %arg1: i32) -> (i32, i32, i32) {
    %c0_i32 = arith.constant 0 : i32
    %c0_i32_0 = arith.constant 0 : i32
    %c0_i32_1 = arith.constant 0 : i32
    return %arg0, %c0_i32, %c0_i32_0 : i32, i32, i32
  }
}

module attributes {stable_mosaic.version = 11 : i64} {
  func.func @kernel(%arg0: i32, %arg1: i32, %arg2: memref<1x64x128xf32, #tpu.memory_space<vmem>>, %arg3: memref<1x1x128xf32, #tpu.memory_space<vmem>>, %arg4: memref<1x1x128xf32, #tpu.memory_space<vmem>>, %arg5: memref<1x64x128xf32, #tpu.memory_space<vmem>>) attributes {dimension_semantics = [#tpu.dimension_semantics<parallel>, #tpu.dimension_semantics<parallel>], iteration_bounds = array<i64: 2, 1>, scalar_prefetch = 0 : i64, scratch_operands = 0 : i64, tpu.core_type = #tpu.core_type<tc>, window_params = [{transform_indices = @transform_0, window_bounds = array<i64: 1, 64, 128>}, {transform_indices = @transform_1, window_bounds = array<i64: 1, 1, 128>}, {transform_indices = @transform_2, window_bounds = array<i64: 1, 1, 128>}, {transform_indices = @transform_3, window_bounds = array<i64: 1, 64, 128>}]} {
    %c0 = arith.constant 0 : index
    %c0_0 = arith.constant 0 : index
    %c0_1 = arith.constant 0 : index
    %0 = vector.load %arg2[%c0, %c0_0, %c0_1] : memref<1x64x128xf32, #tpu.memory_space<vmem>>, vector<1x64x128xf32>
    %1 = vector.shape_cast %0 : vector<1x64x128xf32> to vector<64x128xf32>
    %c0_2 = arith.constant 0 : index
    %c0_3 = arith.constant 0 : index
    %c0_4 = arith.constant 0 : index
    %2 = vector.load %arg3[%c0_2, %c0_3, %c0_4] : memref<1x1x128xf32, #tpu.memory_space<vmem>>, vector<1x1x128xf32>
    %3 = vector.shape_cast %2 : vector<1x1x128xf32> to vector<1x128xf32>
    %cst = arith.constant 1.562500e-02 : f32
    %4 = vector.broadcast %cst : f32 to vector<1x128xf32>
    %5 = arith.mulf %3, %4 : vector<1x128xf32>
    %c0_5 = arith.constant 0 : index
    %c0_6 = arith.constant 0 : index
    %c0_7 = arith.constant 0 : index
    %6 = vector.load %arg4[%c0_5, %c0_6, %c0_7] : memref<1x1x128xf32, #tpu.memory_space<vmem>>, vector<1x1x128xf32>
    %7 = vector.shape_cast %6 : vector<1x1x128xf32> to vector<1x128xf32>
    %cst_8 = arith.constant 1.562500e-02 : f32
    %8 = vector.broadcast %cst_8 : f32 to vector<1x128xf32>
    %9 = arith.mulf %7, %8 : vector<1x128xf32>
    %10 = arith.mulf %5, %5 : vector<1x128xf32>
    %11 = arith.subf %9, %10 : vector<1x128xf32>
    %cst_9 = arith.constant 0.000000e+00 : f32
    %12 = vector.broadcast %cst_9 : f32 to vector<1x128xf32>
    %13 = arith.maximumf %11, %12 : vector<1x128xf32>
    %14 = vector.broadcast %5 : vector<1x128xf32> to vector<64x128xf32>
    %15 = arith.subf %1, %14 : vector<64x128xf32>
    %cst_10 = arith.constant 9.99999974E-6 : f32
    %16 = vector.broadcast %cst_10 : f32 to vector<1x128xf32>
    %17 = arith.addf %13, %16 : vector<1x128xf32>
    %18 = math.rsqrt %17 : vector<1x128xf32>
    %19 = vector.broadcast %18 : vector<1x128xf32> to vector<64x128xf32>
    %20 = arith.mulf %15, %19 : vector<64x128xf32>
    %cst_11 = arith.constant 0.000000e+00 : f32
    %21 = vector.broadcast %cst_11 : f32 to vector<64x128xf32>
    %22 = arith.cmpf ogt, %20, %21 : vector<64x128xf32>
    %cst_12 = arith.constant 2.000000e-01 : f32
    %23 = vector.broadcast %cst_12 : f32 to vector<64x128xf32>
    %24 = arith.mulf %23, %20 : vector<64x128xf32>
    %25 = arith.select %22, %20, %24 : vector<64x128xi1>, vector<64x128xf32>
    %c0_13 = arith.constant 0 : index
    %c0_14 = arith.constant 0 : index
    %c0_15 = arith.constant 0 : index
    %26 = vector.load %arg5[%c0_13, %c0_14, %c0_15] : memref<1x64x128xf32, #tpu.memory_space<vmem>>, vector<1x64x128xf32>
    %27 = vector.shape_cast %26 : vector<1x64x128xf32> to vector<64x128xf32>
    %28 = vector.shape_cast %25 : vector<64x128xf32> to vector<1x64x128xf32>
    tpu.vector_store %arg5[%c0_13, %c0_14, %c0_15], %28 {strides = array<i32>} : memref<1x64x128xf32, #tpu.memory_space<vmem>>, vector<1x64x128xf32>,
    return
  }
  func.func @transform_0(%arg0: i32, %arg1: i32) -> (i32, i32, i32) {
    %c0_i32 = arith.constant 0 : i32
    %c0_i32_0 = arith.constant 0 : i32
    return %arg0, %arg1, %c0_i32 : i32, i32, i32
  }
  func.func @transform_1(%arg0: i32, %arg1: i32) -> (i32, i32, i32) {
    %c0_i32 = arith.constant 0 : i32
    %c0_i32_0 = arith.constant 0 : i32
    %c0_i32_1 = arith.constant 0 : i32
    return %arg0, %c0_i32, %c0_i32_0 : i32, i32, i32
  }
  func.func @transform_2(%arg0: i32, %arg1: i32) -> (i32, i32, i32) {
    %c0_i32 = arith.constant 0 : i32
    %c0_i32_0 = arith.constant 0 : i32
    %c0_i32_1 = arith.constant 0 : i32
    return %arg0, %c0_i32, %c0_i32_0 : i32, i32, i32
  }
  func.func @transform_3(%arg0: i32, %arg1: i32) -> (i32, i32, i32) {
    %c0_i32 = arith.constant 0 : i32
    %c0_i32_0 = arith.constant 0 : i32
    return %arg0, %arg1, %c0_i32 : i32, i32, i32
  }
}

module attributes {stable_mosaic.version = 11 : i64} {
  func.func @kernel(%arg0: i32, %arg1: i32, %arg2: memref<1x16x128xf32, #tpu.memory_space<vmem>>, %arg3: memref<1x1x128xf32, #tpu.memory_space<vmem>>, %arg4: memref<1x1x128xf32, #tpu.memory_space<vmem>>, %arg5: memref<1x16x128xf32, #tpu.memory_space<vmem>>) attributes {dimension_semantics = [#tpu.dimension_semantics<parallel>, #tpu.dimension_semantics<parallel>], iteration_bounds = array<i64: 2, 1>, scalar_prefetch = 0 : i64, scratch_operands = 0 : i64, tpu.core_type = #tpu.core_type<tc>, window_params = [{transform_indices = @transform_0, window_bounds = array<i64: 1, 16, 128>}, {transform_indices = @transform_1, window_bounds = array<i64: 1, 1, 128>}, {transform_indices = @transform_2, window_bounds = array<i64: 1, 1, 128>}, {transform_indices = @transform_3, window_bounds = array<i64: 1, 16, 128>}]} {
    %c0 = arith.constant 0 : index
    %c0_0 = arith.constant 0 : index
    %c0_1 = arith.constant 0 : index
    %0 = vector.load %arg2[%c0, %c0_0, %c0_1] : memref<1x16x128xf32, #tpu.memory_space<vmem>>, vector<1x16x128xf32>
    %1 = vector.shape_cast %0 : vector<1x16x128xf32> to vector<16x128xf32>
    %c0_2 = arith.constant 0 : index
    %c0_3 = arith.constant 0 : index
    %c0_4 = arith.constant 0 : index
    %2 = vector.load %arg3[%c0_2, %c0_3, %c0_4] : memref<1x1x128xf32, #tpu.memory_space<vmem>>, vector<1x1x128xf32>
    %3 = vector.shape_cast %2 : vector<1x1x128xf32> to vector<1x128xf32>
    %cst = arith.constant 6.250000e-02 : f32
    %4 = vector.broadcast %cst : f32 to vector<1x128xf32>
    %5 = arith.mulf %3, %4 : vector<1x128xf32>
    %c0_5 = arith.constant 0 : index
    %c0_6 = arith.constant 0 : index
    %c0_7 = arith.constant 0 : index
    %6 = vector.load %arg4[%c0_5, %c0_6, %c0_7] : memref<1x1x128xf32, #tpu.memory_space<vmem>>, vector<1x1x128xf32>
    %7 = vector.shape_cast %6 : vector<1x1x128xf32> to vector<1x128xf32>
    %cst_8 = arith.constant 6.250000e-02 : f32
    %8 = vector.broadcast %cst_8 : f32 to vector<1x128xf32>
    %9 = arith.mulf %7, %8 : vector<1x128xf32>
    %10 = arith.mulf %5, %5 : vector<1x128xf32>
    %11 = arith.subf %9, %10 : vector<1x128xf32>
    %cst_9 = arith.constant 0.000000e+00 : f32
    %12 = vector.broadcast %cst_9 : f32 to vector<1x128xf32>
    %13 = arith.maximumf %11, %12 : vector<1x128xf32>
    %14 = vector.broadcast %5 : vector<1x128xf32> to vector<16x128xf32>
    %15 = arith.subf %1, %14 : vector<16x128xf32>
    %cst_10 = arith.constant 9.99999974E-6 : f32
    %16 = vector.broadcast %cst_10 : f32 to vector<1x128xf32>
    %17 = arith.addf %13, %16 : vector<1x128xf32>
    %18 = math.rsqrt %17 : vector<1x128xf32>
    %19 = vector.broadcast %18 : vector<1x128xf32> to vector<16x128xf32>
    %20 = arith.mulf %15, %19 : vector<16x128xf32>
    %cst_11 = arith.constant 0.000000e+00 : f32
    %21 = vector.broadcast %cst_11 : f32 to vector<16x128xf32>
    %22 = arith.cmpf ogt, %20, %21 : vector<16x128xf32>
    %cst_12 = arith.constant 2.000000e-01 : f32
    %23 = vector.broadcast %cst_12 : f32 to vector<16x128xf32>
    %24 = arith.mulf %23, %20 : vector<16x128xf32>
    %25 = arith.select %22, %20, %24 : vector<16x128xi1>, vector<16x128xf32>
    %c0_13 = arith.constant 0 : index
    %c0_14 = arith.constant 0 : index
    %c0_15 = arith.constant 0 : index
    %26 = vector.load %arg5[%c0_13, %c0_14, %c0_15] : memref<1x16x128xf32, #tpu.memory_space<vmem>>, vector<1x16x128xf32>
    %27 = vector.shape_cast %26 : vector<1x16x128xf32> to vector<16x128xf32>
    %28 = vector.shape_cast %25 : vector<16x128xf32> to vector<1x16x128xf32>
    tpu.vector_store %arg5[%c0_13, %c0_14, %c0_15], %28 {strides = array<i32>} : memref<1x16x128xf32, #tpu.memory_space<vmem>>, vector<1x16x128xf32>,
    return
  }
  func.func @transform_0(%arg0: i32, %arg1: i32) -> (i32, i32, i32) {
    %c0_i32 = arith.constant 0 : i32
    %c0_i32_0 = arith.constant 0 : i32
    return %arg0, %arg1, %c0_i32 : i32, i32, i32
  }
  func.func @transform_1(%arg0: i32, %arg1: i32) -> (i32, i32, i32) {
    %c0_i32 = arith.constant 0 : i32
    %c0_i32_0 = arith.constant 0 : i32
    %c0_i32_1 = arith.constant 0 : i32
    return %arg0, %c0_i32, %c0_i32_0 : i32, i32, i32
  }
  func.func @transform_2(%arg0: i32, %arg1: i32) -> (i32, i32, i32) {
    %c0_i32 = arith.constant 0 : i32
    %c0_i32_0 = arith.constant 0 : i32
    %c0_i32_1 = arith.constant 0 : i32
    return %arg0, %c0_i32, %c0_i32_0 : i32, i32, i32
  }
  func.func @transform_3(%arg0: i32, %arg1: i32) -> (i32, i32, i32) {
    %c0_i32 = arith.constant 0 : i32
    %c0_i32_0 = arith.constant 0 : i32
    return %arg0, %arg1, %c0_i32 : i32, i32, i32
  }
}

module attributes {stable_mosaic.version = 11 : i64} {
  func.func @kernel(%arg0: i32, %arg1: i32, %arg2: memref<1x16x256xbf16, #tpu.memory_space<vmem>>, %arg3: memref<256x128xbf16, #tpu.memory_space<vmem>>, %arg4: memref<1x128xf32, #tpu.memory_space<vmem>>, %arg5: memref<1x16x128xf32, #tpu.memory_space<vmem>>, %arg6: memref<1x1x128xf32, #tpu.memory_space<vmem>>, %arg7: memref<1x1x128xf32, #tpu.memory_space<vmem>>) attributes {dimension_semantics = [#tpu.dimension_semantics<parallel>, #tpu.dimension_semantics<arbitrary>], iteration_bounds = array<i64: 2, 1>, scalar_prefetch = 0 : i64, scratch_operands = 0 : i64, tpu.core_type = #tpu.core_type<tc>, window_params = [{transform_indices = @transform_0, window_bounds = array<i64: 1, 16, 256>}, {pipeline_mode = #tpu.pipeline_mode<synchronous>, transform_indices = @transform_1, window_bounds = array<i64: 256, 128>}, {pipeline_mode = #tpu.pipeline_mode<synchronous>, transform_indices = @transform_2, window_bounds = array<i64: 1, 128>}, {transform_indices = @transform_3, window_bounds = array<i64: 1, 16, 128>}, {transform_indices = @transform_4, window_bounds = array<i64: 1, 1, 128>}, {transform_indices = @transform_5, window_bounds = array<i64: 1, 1, 128>}]} {
    %c0 = arith.constant 0 : index
    %c0_0 = arith.constant 0 : index
    %c0_1 = arith.constant 0 : index
    %0 = vector.load %arg2[%c0, %c0_0, %c0_1] : memref<1x16x256xbf16, #tpu.memory_space<vmem>>, vector<1x16x256xbf16>
    %1 = vector.shape_cast %0 : vector<1x16x256xbf16> to vector<16x256xbf16>
    %c0_2 = arith.constant 0 : index
    %c0_3 = arith.constant 0 : index
    %2 = vector.load %arg3[%c0_2, %c0_3] : memref<256x128xbf16, #tpu.memory_space<vmem>>, vector<256x128xbf16>
    %cst = arith.constant dense<0.000000e+00> : vector<16x128xf32>
    %3 = tpu.matmul %1, %2, %cst {dimension_numbers = #tpu.dot_dimension_numbers<[1], [0], [0], [1], [0, 0, 1, 1], [], []>} : vector<16x256xbf16>, vector<256x128xbf16>, vector<16x128xf32> -> vector<16x128xf32>
    %c0_4 = arith.constant 0 : index
    %c0_5 = arith.constant 0 : index
    %4 = vector.load %arg4[%c0_4, %c0_5] : memref<1x128xf32, #tpu.memory_space<vmem>>, vector<1x128xf32>
    %5 = vector.broadcast %4 : vector<1x128xf32> to vector<16x128xf32>
    %6 = arith.addf %3, %5 : vector<16x128xf32>
    %c0_6 = arith.constant 0 : index
    %c0_7 = arith.constant 0 : index
    %c0_8 = arith.constant 0 : index
    %7 = vector.load %arg5[%c0_6, %c0_7, %c0_8] : memref<1x16x128xf32, #tpu.memory_space<vmem>>, vector<1x16x128xf32>
    %8 = vector.shape_cast %7 : vector<1x16x128xf32> to vector<16x128xf32>
    %9 = vector.shape_cast %6 : vector<16x128xf32> to vector<1x16x128xf32>
    tpu.vector_store %arg5[%c0_6, %c0_7, %c0_8], %9 {strides = array<i32>} : memref<1x16x128xf32, #tpu.memory_space<vmem>>, vector<1x16x128xf32>,
    %c0_i32 = arith.constant 0 : i32
    %10 = arith.cmpi eq, %arg1, %c0_i32 : i32
    %11 = arith.extui %10 : i1 to i32
    %c0_i32_9 = arith.constant 0 : i32
    %12 = arith.cmpi ne, %11, %c0_i32_9 : i32
    scf.if %12 {
      %cst_24 = arith.constant 0.000000e+00 : f32
      %30 = vector.broadcast %cst_24 : f32 to vector<1x128xf32>
      %c0_25 = arith.constant 0 : index
      %c0_26 = arith.constant 0 : index
      %c0_27 = arith.constant 0 : index
      %31 = vector.load %arg6[%c0_25, %c0_26, %c0_27] : memref<1x1x128xf32, #tpu.memory_space<vmem>>, vector<1x1x128xf32>
      %32 = vector.shape_cast %31 : vector<1x1x128xf32> to vector<1x128xf32>
      %33 = vector.shape_cast %30 : vector<1x128xf32> to vector<1x1x128xf32>
      tpu.vector_store %arg6[%c0_25, %c0_26, %c0_27], %33 {strides = array<i32>} : memref<1x1x128xf32, #tpu.memory_space<vmem>>, vector<1x1x128xf32>,
      %cst_28 = arith.constant 0.000000e+00 : f32
      %34 = vector.broadcast %cst_28 : f32 to vector<1x128xf32>
      %c0_29 = arith.constant 0 : index
      %c0_30 = arith.constant 0 : index
      %c0_31 = arith.constant 0 : index
      %35 = vector.load %arg7[%c0_29, %c0_30, %c0_31] : memref<1x1x128xf32, #tpu.memory_space<vmem>>, vector<1x1x128xf32>
      %36 = vector.shape_cast %35 : vector<1x1x128xf32> to vector<1x128xf32>
      %37 = vector.shape_cast %34 : vector<1x128xf32> to vector<1x1x128xf32>
      tpu.vector_store %arg7[%c0_29, %c0_30, %c0_31], %37 {strides = array<i32>} : memref<1x1x128xf32, #tpu.memory_space<vmem>>, vector<1x1x128xf32>,
    } else {
    }
    %c0_10 = arith.constant 0 : index
    %c0_11 = arith.constant 0 : index
    %c0_12 = arith.constant 0 : index
    %13 = vector.load %arg6[%c0_10, %c0_11, %c0_12] : memref<1x1x128xf32, #tpu.memory_space<vmem>>, vector<1x1x128xf32>
    %14 = vector.shape_cast %13 : vector<1x1x128xf32> to vector<1x128xf32>
    %cst_13 = arith.constant dense<0.000000e+00> : vector<128xf32>
    %15 = vector.multi_reduction <add>, %6, %cst_13 [0] : vector<16x128xf32> to vector<128xf32>
    %16 = vector.shape_cast %15 : vector<128xf32> to vector<1x128xf32>
    %17 = arith.addf %14, %16 : vector<1x128xf32>
    %c0_14 = arith.constant 0 : index
    %c0_15 = arith.constant 0 : index
    %c0_16 = arith.constant 0 : index
    %18 = vector.load %arg6[%c0_14, %c0_15, %c0_16] : memref<1x1x128xf32, #tpu.memory_space<vmem>>, vector<1x1x128xf32>
    %19 = vector.shape_cast %18 : vector<1x1x128xf32> to vector<1x128xf32>
    %20 = vector.shape_cast %17 : vector<1x128xf32> to vector<1x1x128xf32>
    tpu.vector_store %arg6[%c0_14, %c0_15, %c0_16], %20 {strides = array<i32>} : memref<1x1x128xf32, #tpu.memory_space<vmem>>, vector<1x1x128xf32>,
    %c0_17 = arith.constant 0 : index
    %c0_18 = arith.constant 0 : index
    %c0_19 = arith.constant 0 : index
    %21 = vector.load %arg7[%c0_17, %c0_18, %c0_19] : memref<1x1x128xf32, #tpu.memory_space<vmem>>, vector<1x1x128xf32>
    %22 = vector.shape_cast %21 : vector<1x1x128xf32> to vector<1x128xf32>
    %23 = arith.mulf %6, %6 : vector<16x128xf32>
    %cst_20 = arith.constant dense<0.000000e+00> : vector<128xf32>
    %24 = vector.multi_reduction <add>, %23, %cst_20 [0] : vector<16x128xf32> to vector<128xf32>
    %25 = vector.shape_cast %24 : vector<128xf32> to vector<1x128xf32>
    %26 = arith.addf %22, %25 : vector<1x128xf32>
    %c0_21 = arith.constant 0 : index
    %c0_22 = arith.constant 0 : index
    %c0_23 = arith.constant 0 : index
    %27 = vector.load %arg7[%c0_21, %c0_22, %c0_23] : memref<1x1x128xf32, #tpu.memory_space<vmem>>, vector<1x1x128xf32>
    %28 = vector.shape_cast %27 : vector<1x1x128xf32> to vector<1x128xf32>
    %29 = vector.shape_cast %26 : vector<1x128xf32> to vector<1x1x128xf32>
    tpu.vector_store %arg7[%c0_21, %c0_22, %c0_23], %29 {strides = array<i32>} : memref<1x1x128xf32, #tpu.memory_space<vmem>>, vector<1x1x128xf32>,
    return
  }
  func.func @transform_0(%arg0: i32, %arg1: i32) -> (i32, i32, i32) {
    %c0_i32 = arith.constant 0 : i32
    %c0_i32_0 = arith.constant 0 : i32
    return %arg0, %arg1, %c0_i32 : i32, i32, i32
  }
  func.func @transform_1(%arg0: i32, %arg1: i32) -> (i32, i32) {
    %c0_i32 = arith.constant 0 : i32
    %c0_i32_0 = arith.constant 0 : i32
    %c0_i32_1 = arith.constant 0 : i32
    return %c0_i32, %c0_i32_0 : i32, i32
  }
  func.func @transform_2(%arg0: i32, %arg1: i32) -> (i32, i32) {
    %c0_i32 = arith.constant 0 : i32
    %c0_i32_0 = arith.constant 0 : i32
    %c0_i32_1 = arith.constant 0 : i32
    return %c0_i32, %c0_i32_0 : i32, i32
  }
  func.func @transform_3(%arg0: i32, %arg1: i32) -> (i32, i32, i32) {
    %c0_i32 = arith.constant 0 : i32
    %c0_i32_0 = arith.constant 0 : i32
    return %arg0, %arg1, %c0_i32 : i32, i32, i32
  }
  func.func @transform_4(%arg0: i32, %arg1: i32) -> (i32, i32, i32) {
    %c0_i32 = arith.constant 0 : i32
    %c0_i32_0 = arith.constant 0 : i32
    %c0_i32_1 = arith.constant 0 : i32
    return %arg0, %c0_i32, %c0_i32_0 : i32, i32, i32
  }
  func.func @transform_5(%arg0: i32, %arg1: i32) -> (i32, i32, i32) {
    %c0_i32 = arith.constant 0 : i32
    %c0_i32_0 = arith.constant 0 : i32
    %c0_i32_1 = arith.constant 0 : i32
    return %arg0, %c0_i32, %c0_i32_0 : i32, i32, i32
  }
}

module attributes {stable_mosaic.version = 11 : i64} {
  func.func @kernel(%arg0: i32, %arg1: i32, %arg2: memref<1x4x128xf32, #tpu.memory_space<vmem>>, %arg3: memref<1x1x128xf32, #tpu.memory_space<vmem>>, %arg4: memref<1x1x128xf32, #tpu.memory_space<vmem>>, %arg5: memref<1x4x128xf32, #tpu.memory_space<vmem>>) attributes {dimension_semantics = [#tpu.dimension_semantics<parallel>, #tpu.dimension_semantics<parallel>], iteration_bounds = array<i64: 2, 1>, scalar_prefetch = 0 : i64, scratch_operands = 0 : i64, tpu.core_type = #tpu.core_type<tc>, window_params = [{transform_indices = @transform_0, window_bounds = array<i64: 1, 4, 128>}, {transform_indices = @transform_1, window_bounds = array<i64: 1, 1, 128>}, {transform_indices = @transform_2, window_bounds = array<i64: 1, 1, 128>}, {transform_indices = @transform_3, window_bounds = array<i64: 1, 4, 128>}]} {
    %c0 = arith.constant 0 : index
    %c0_0 = arith.constant 0 : index
    %c0_1 = arith.constant 0 : index
    %0 = vector.load %arg2[%c0, %c0_0, %c0_1] : memref<1x4x128xf32, #tpu.memory_space<vmem>>, vector<1x4x128xf32>
    %1 = vector.shape_cast %0 : vector<1x4x128xf32> to vector<4x128xf32>
    %c0_2 = arith.constant 0 : index
    %c0_3 = arith.constant 0 : index
    %c0_4 = arith.constant 0 : index
    %2 = vector.load %arg3[%c0_2, %c0_3, %c0_4] : memref<1x1x128xf32, #tpu.memory_space<vmem>>, vector<1x1x128xf32>
    %3 = vector.shape_cast %2 : vector<1x1x128xf32> to vector<1x128xf32>
    %cst = arith.constant 2.500000e-01 : f32
    %4 = vector.broadcast %cst : f32 to vector<1x128xf32>
    %5 = arith.mulf %3, %4 : vector<1x128xf32>
    %c0_5 = arith.constant 0 : index
    %c0_6 = arith.constant 0 : index
    %c0_7 = arith.constant 0 : index
    %6 = vector.load %arg4[%c0_5, %c0_6, %c0_7] : memref<1x1x128xf32, #tpu.memory_space<vmem>>, vector<1x1x128xf32>
    %7 = vector.shape_cast %6 : vector<1x1x128xf32> to vector<1x128xf32>
    %cst_8 = arith.constant 2.500000e-01 : f32
    %8 = vector.broadcast %cst_8 : f32 to vector<1x128xf32>
    %9 = arith.mulf %7, %8 : vector<1x128xf32>
    %10 = arith.mulf %5, %5 : vector<1x128xf32>
    %11 = arith.subf %9, %10 : vector<1x128xf32>
    %cst_9 = arith.constant 0.000000e+00 : f32
    %12 = vector.broadcast %cst_9 : f32 to vector<1x128xf32>
    %13 = arith.maximumf %11, %12 : vector<1x128xf32>
    %14 = vector.broadcast %5 : vector<1x128xf32> to vector<4x128xf32>
    %15 = arith.subf %1, %14 : vector<4x128xf32>
    %cst_10 = arith.constant 9.99999974E-6 : f32
    %16 = vector.broadcast %cst_10 : f32 to vector<1x128xf32>
    %17 = arith.addf %13, %16 : vector<1x128xf32>
    %18 = math.rsqrt %17 : vector<1x128xf32>
    %19 = vector.broadcast %18 : vector<1x128xf32> to vector<4x128xf32>
    %20 = arith.mulf %15, %19 : vector<4x128xf32>
    %cst_11 = arith.constant 0.000000e+00 : f32
    %21 = vector.broadcast %cst_11 : f32 to vector<4x128xf32>
    %22 = arith.cmpf ogt, %20, %21 : vector<4x128xf32>
    %cst_12 = arith.constant 2.000000e-01 : f32
    %23 = vector.broadcast %cst_12 : f32 to vector<4x128xf32>
    %24 = arith.mulf %23, %20 : vector<4x128xf32>
    %25 = arith.select %22, %20, %24 : vector<4x128xi1>, vector<4x128xf32>
    %c0_13 = arith.constant 0 : index
    %c0_14 = arith.constant 0 : index
    %c0_15 = arith.constant 0 : index
    %26 = vector.load %arg5[%c0_13, %c0_14, %c0_15] : memref<1x4x128xf32, #tpu.memory_space<vmem>>, vector<1x4x128xf32>
    %27 = vector.shape_cast %26 : vector<1x4x128xf32> to vector<4x128xf32>
    %28 = vector.shape_cast %25 : vector<4x128xf32> to vector<1x4x128xf32>
    tpu.vector_store %arg5[%c0_13, %c0_14, %c0_15], %28 {strides = array<i32>} : memref<1x4x128xf32, #tpu.memory_space<vmem>>, vector<1x4x128xf32>,
    return
  }
  func.func @transform_0(%arg0: i32, %arg1: i32) -> (i32, i32, i32) {
    %c0_i32 = arith.constant 0 : i32
    %c0_i32_0 = arith.constant 0 : i32
    return %arg0, %arg1, %c0_i32 : i32, i32, i32
  }
  func.func @transform_1(%arg0: i32, %arg1: i32) -> (i32, i32, i32) {
    %c0_i32 = arith.constant 0 : i32
    %c0_i32_0 = arith.constant 0 : i32
    %c0_i32_1 = arith.constant 0 : i32
    return %arg0, %c0_i32, %c0_i32_0 : i32, i32, i32
  }
  func.func @transform_2(%arg0: i32, %arg1: i32) -> (i32, i32, i32) {
    %c0_i32 = arith.constant 0 : i32
    %c0_i32_0 = arith.constant 0 : i32
    %c0_i32_1 = arith.constant 0 : i32
    return %arg0, %c0_i32, %c0_i32_0 : i32, i32, i32
  }
  func.func @transform_3(%arg0: i32, %arg1: i32) -> (i32, i32, i32) {
    %c0_i32 = arith.constant 0 : i32
    %c0_i32_0 = arith.constant 0 : i32
    return %arg0, %arg1, %c0_i32 : i32, i32, i32
  }
}

module attributes {stable_mosaic.version = 11 : i64} {
  func.func @kernel(%arg0: i32, %arg1: i32, %arg2: memref<1x4x512xbf16, #tpu.memory_space<vmem>>, %arg3: memref<512x128xbf16, #tpu.memory_space<vmem>>, %arg4: memref<1x128xf32, #tpu.memory_space<vmem>>, %arg5: memref<1x4x128xf32, #tpu.memory_space<vmem>>, %arg6: memref<1x1x128xf32, #tpu.memory_space<vmem>>, %arg7: memref<1x1x128xf32, #tpu.memory_space<vmem>>) attributes {dimension_semantics = [#tpu.dimension_semantics<parallel>, #tpu.dimension_semantics<arbitrary>], iteration_bounds = array<i64: 2, 1>, scalar_prefetch = 0 : i64, scratch_operands = 0 : i64, tpu.core_type = #tpu.core_type<tc>, window_params = [{transform_indices = @transform_0, window_bounds = array<i64: 1, 4, 512>}, {pipeline_mode = #tpu.pipeline_mode<synchronous>, transform_indices = @transform_1, window_bounds = array<i64: 512, 128>}, {pipeline_mode = #tpu.pipeline_mode<synchronous>, transform_indices = @transform_2, window_bounds = array<i64: 1, 128>}, {transform_indices = @transform_3, window_bounds = array<i64: 1, 4, 128>}, {transform_indices = @transform_4, window_bounds = array<i64: 1, 1, 128>}, {transform_indices = @transform_5, window_bounds = array<i64: 1, 1, 128>}]} {
    %c0 = arith.constant 0 : index
    %c0_0 = arith.constant 0 : index
    %c0_1 = arith.constant 0 : index
    %0 = vector.load %arg2[%c0, %c0_0, %c0_1] : memref<1x4x512xbf16, #tpu.memory_space<vmem>>, vector<1x4x512xbf16>
    %1 = vector.shape_cast %0 : vector<1x4x512xbf16> to vector<4x512xbf16>
    %c0_2 = arith.constant 0 : index
    %c0_3 = arith.constant 0 : index
    %2 = vector.load %arg3[%c0_2, %c0_3] : memref<512x128xbf16, #tpu.memory_space<vmem>>, vector<512x128xbf16>
    %cst = arith.constant dense<0.000000e+00> : vector<4x128xf32>
    %3 = tpu.matmul %1, %2, %cst {dimension_numbers = #tpu.dot_dimension_numbers<[1], [0], [0], [1], [0, 0, 1, 1], [], []>} : vector<4x512xbf16>, vector<512x128xbf16>, vector<4x128xf32> -> vector<4x128xf32>
    %c0_4 = arith.constant 0 : index
    %c0_5 = arith.constant 0 : index
    %4 = vector.load %arg4[%c0_4, %c0_5] : memref<1x128xf32, #tpu.memory_space<vmem>>, vector<1x128xf32>
    %5 = vector.broadcast %4 : vector<1x128xf32> to vector<4x128xf32>
    %6 = arith.addf %3, %5 : vector<4x128xf32>
    %c0_6 = arith.constant 0 : index
    %c0_7 = arith.constant 0 : index
    %c0_8 = arith.constant 0 : index
    %7 = vector.load %arg5[%c0_6, %c0_7, %c0_8] : memref<1x4x128xf32, #tpu.memory_space<vmem>>, vector<1x4x128xf32>
    %8 = vector.shape_cast %7 : vector<1x4x128xf32> to vector<4x128xf32>
    %9 = vector.shape_cast %6 : vector<4x128xf32> to vector<1x4x128xf32>
    tpu.vector_store %arg5[%c0_6, %c0_7, %c0_8], %9 {strides = array<i32>} : memref<1x4x128xf32, #tpu.memory_space<vmem>>, vector<1x4x128xf32>,
    %c0_i32 = arith.constant 0 : i32
    %10 = arith.cmpi eq, %arg1, %c0_i32 : i32
    %11 = arith.extui %10 : i1 to i32
    %c0_i32_9 = arith.constant 0 : i32
    %12 = arith.cmpi ne, %11, %c0_i32_9 : i32
    scf.if %12 {
      %cst_24 = arith.constant 0.000000e+00 : f32
      %30 = vector.broadcast %cst_24 : f32 to vector<1x128xf32>
      %c0_25 = arith.constant 0 : index
      %c0_26 = arith.constant 0 : index
      %c0_27 = arith.constant 0 : index
      %31 = vector.load %arg6[%c0_25, %c0_26, %c0_27] : memref<1x1x128xf32, #tpu.memory_space<vmem>>, vector<1x1x128xf32>
      %32 = vector.shape_cast %31 : vector<1x1x128xf32> to vector<1x128xf32>
      %33 = vector.shape_cast %30 : vector<1x128xf32> to vector<1x1x128xf32>
      tpu.vector_store %arg6[%c0_25, %c0_26, %c0_27], %33 {strides = array<i32>} : memref<1x1x128xf32, #tpu.memory_space<vmem>>, vector<1x1x128xf32>,
      %cst_28 = arith.constant 0.000000e+00 : f32
      %34 = vector.broadcast %cst_28 : f32 to vector<1x128xf32>
      %c0_29 = arith.constant 0 : index
      %c0_30 = arith.constant 0 : index
      %c0_31 = arith.constant 0 : index
      %35 = vector.load %arg7[%c0_29, %c0_30, %c0_31] : memref<1x1x128xf32, #tpu.memory_space<vmem>>, vector<1x1x128xf32>
      %36 = vector.shape_cast %35 : vector<1x1x128xf32> to vector<1x128xf32>
      %37 = vector.shape_cast %34 : vector<1x128xf32> to vector<1x1x128xf32>
      tpu.vector_store %arg7[%c0_29, %c0_30, %c0_31], %37 {strides = array<i32>} : memref<1x1x128xf32, #tpu.memory_space<vmem>>, vector<1x1x128xf32>,
    } else {
    }
    %c0_10 = arith.constant 0 : index
    %c0_11 = arith.constant 0 : index
    %c0_12 = arith.constant 0 : index
    %13 = vector.load %arg6[%c0_10, %c0_11, %c0_12] : memref<1x1x128xf32, #tpu.memory_space<vmem>>, vector<1x1x128xf32>
    %14 = vector.shape_cast %13 : vector<1x1x128xf32> to vector<1x128xf32>
    %cst_13 = arith.constant dense<0.000000e+00> : vector<128xf32>
    %15 = vector.multi_reduction <add>, %6, %cst_13 [0] : vector<4x128xf32> to vector<128xf32>
    %16 = vector.shape_cast %15 : vector<128xf32> to vector<1x128xf32>
    %17 = arith.addf %14, %16 : vector<1x128xf32>
    %c0_14 = arith.constant 0 : index
    %c0_15 = arith.constant 0 : index
    %c0_16 = arith.constant 0 : index
    %18 = vector.load %arg6[%c0_14, %c0_15, %c0_16] : memref<1x1x128xf32, #tpu.memory_space<vmem>>, vector<1x1x128xf32>
    %19 = vector.shape_cast %18 : vector<1x1x128xf32> to vector<1x128xf32>
    %20 = vector.shape_cast %17 : vector<1x128xf32> to vector<1x1x128xf32>
    tpu.vector_store %arg6[%c0_14, %c0_15, %c0_16], %20 {strides = array<i32>} : memref<1x1x128xf32, #tpu.memory_space<vmem>>, vector<1x1x128xf32>,
    %c0_17 = arith.constant 0 : index
    %c0_18 = arith.constant 0 : index
    %c0_19 = arith.constant 0 : index
    %21 = vector.load %arg7[%c0_17, %c0_18, %c0_19] : memref<1x1x128xf32, #tpu.memory_space<vmem>>, vector<1x1x128xf32>
    %22 = vector.shape_cast %21 : vector<1x1x128xf32> to vector<1x128xf32>
    %23 = arith.mulf %6, %6 : vector<4x128xf32>
    %cst_20 = arith.constant dense<0.000000e+00> : vector<128xf32>
    %24 = vector.multi_reduction <add>, %23, %cst_20 [0] : vector<4x128xf32> to vector<128xf32>
    %25 = vector.shape_cast %24 : vector<128xf32> to vector<1x128xf32>
    %26 = arith.addf %22, %25 : vector<1x128xf32>
    %c0_21 = arith.constant 0 : index
    %c0_22 = arith.constant 0 : index
    %c0_23 = arith.constant 0 : index
    %27 = vector.load %arg7[%c0_21, %c0_22, %c0_23] : memref<1x1x128xf32, #tpu.memory_space<vmem>>, vector<1x1x128xf32>
    %28 = vector.shape_cast %27 : vector<1x1x128xf32> to vector<1x128xf32>
    %29 = vector.shape_cast %26 : vector<1x128xf32> to vector<1x1x128xf32>
    tpu.vector_store %arg7[%c0_21, %c0_22, %c0_23], %29 {strides = array<i32>} : memref<1x1x128xf32, #tpu.memory_space<vmem>>, vector<1x1x128xf32>,
    return
  }
  func.func @transform_0(%arg0: i32, %arg1: i32) -> (i32, i32, i32) {
    %c0_i32 = arith.constant 0 : i32
    %c0_i32_0 = arith.constant 0 : i32
    return %arg0, %arg1, %c0_i32 : i32, i32, i32
  }
  func.func @transform_1(%arg0: i32, %arg1: i32) -> (i32, i32) {
    %c0_i32 = arith.constant 0 : i32
    %c0_i32_0 = arith.constant 0 : i32
    %c0_i32_1 = arith.constant 0 : i32
    return %c0_i32, %c0_i32_0 : i32, i32
  }
  func.func @transform_2(%arg0: i32, %arg1: i32) -> (i32, i32) {
    %c0_i32 = arith.constant 0 : i32
    %c0_i32_0 = arith.constant 0 : i32
    %c0_i32_1 = arith.constant 0 : i32
    return %c0_i32, %c0_i32_0 : i32, i32
  }
  func.func @transform_3(%arg0: i32, %arg1: i32) -> (i32, i32, i32) {
    %c0_i32 = arith.constant 0 : i32
    %c0_i32_0 = arith.constant 0 : i32
    return %arg0, %arg1, %c0_i32 : i32, i32, i32
  }
  func.func @transform_4(%arg0: i32, %arg1: i32) -> (i32, i32, i32) {
    %c0_i32 = arith.constant 0 : i32
    %c0_i32_0 = arith.constant 0 : i32
    %c0_i32_1 = arith.constant 0 : i32
    return %arg0, %c0_i32, %c0_i32_0 : i32, i32, i32
  }
  func.func @transform_5(%arg0: i32, %arg1: i32) -> (i32, i32, i32) {
    %c0_i32 = arith.constant 0 : i32
    %c0_i32_0 = arith.constant 0 : i32
    %c0_i32_1 = arith.constant 0 : i32
    return %arg0, %c0_i32, %c0_i32_0 : i32, i32, i32
  }
}

module attributes {stable_mosaic.version = 11 : i64} {
  func.func @kernel(%arg0: i32, %arg1: i32, %arg2: memref<1x1x1024xbf16, #tpu.memory_space<vmem>>, %arg3: memref<1024x128xbf16, #tpu.memory_space<vmem>>, %arg4: memref<1x128xf32, #tpu.memory_space<vmem>>, %arg5: memref<1x1x128xf32, #tpu.memory_space<vmem>>) attributes {dimension_semantics = [#tpu.dimension_semantics<parallel>, #tpu.dimension_semantics<parallel>], iteration_bounds = array<i64: 2, 1>, scalar_prefetch = 0 : i64, scratch_operands = 0 : i64, tpu.core_type = #tpu.core_type<tc>, window_params = [{transform_indices = @transform_0, window_bounds = array<i64: 1, 1, 1024>}, {pipeline_mode = #tpu.pipeline_mode<synchronous>, transform_indices = @transform_1, window_bounds = array<i64: 1024, 128>}, {pipeline_mode = #tpu.pipeline_mode<synchronous>, transform_indices = @transform_2, window_bounds = array<i64: 1, 128>}, {transform_indices = @transform_3, window_bounds = array<i64: 1, 1, 128>}]} {
    %c0 = arith.constant 0 : index
    %c0_0 = arith.constant 0 : index
    %c0_1 = arith.constant 0 : index
    %0 = vector.load %arg2[%c0, %c0_0, %c0_1] : memref<1x1x1024xbf16, #tpu.memory_space<vmem>>, vector<1x1x1024xbf16>
    %1 = vector.shape_cast %0 : vector<1x1x1024xbf16> to vector<1x1024xbf16>
    %c0_2 = arith.constant 0 : index
    %c0_3 = arith.constant 0 : index
    %2 = vector.load %arg3[%c0_2, %c0_3] : memref<1024x128xbf16, #tpu.memory_space<vmem>>, vector<1024x128xbf16>
    %cst = arith.constant dense<0.000000e+00> : vector<1x128xf32>
    %3 = tpu.matmul %1, %2, %cst {dimension_numbers = #tpu.dot_dimension_numbers<[1], [0], [0], [1], [0, 0, 1, 1], [], []>} : vector<1x1024xbf16>, vector<1024x128xbf16>, vector<1x128xf32> -> vector<1x128xf32>
    %c0_4 = arith.constant 0 : index
    %c0_5 = arith.constant 0 : index
    %4 = vector.load %arg4[%c0_4, %c0_5] : memref<1x128xf32, #tpu.memory_space<vmem>>, vector<1x128xf32>
    %5 = arith.addf %3, %4 : vector<1x128xf32>
    %c0_6 = arith.constant 0 : index
    %c0_7 = arith.constant 0 : index
    %c0_8 = arith.constant 0 : index
    %6 = vector.load %arg5[%c0_6, %c0_7, %c0_8] : memref<1x1x128xf32, #tpu.memory_space<vmem>>, vector<1x1x128xf32>
    %7 = vector.shape_cast %6 : vector<1x1x128xf32> to vector<1x128xf32>
    %8 = vector.shape_cast %5 : vector<1x128xf32> to vector<1x1x128xf32>
    tpu.vector_store %arg5[%c0_6, %c0_7, %c0_8], %8 {strides = array<i32>} : memref<1x1x128xf32, #tpu.memory_space<vmem>>, vector<1x1x128xf32>,
    return
  }
  func.func @transform_0(%arg0: i32, %arg1: i32) -> (i32, i32, i32) {
    %c0_i32 = arith.constant 0 : i32
    %c0_i32_0 = arith.constant 0 : i32
    return %arg0, %arg1, %c0_i32 : i32, i32, i32
  }
  func.func @transform_1(%arg0: i32, %arg1: i32) -> (i32, i32) {
    %c0_i32 = arith.constant 0 : i32
    %c0_i32_0 = arith.constant 0 : i32
    %c0_i32_1 = arith.constant 0 : i32
    return %c0_i32, %c0_i32_0 : i32, i32
  }
  func.func @transform_2(%arg0: i32, %arg1: i32) -> (i32, i32) {
    %c0_i32 = arith.constant 0 : i32
    %c0_i32_0 = arith.constant 0 : i32
    %c0_i32_1 = arith.constant 0 : i32
    return %c0_i32, %c0_i32_0 : i32, i32
  }
  func.func @transform_3(%arg0: i32, %arg1: i32) -> (i32, i32, i32) {
    %c0_i32 = arith.constant 0 : i32
    %c0_i32_0 = arith.constant 0 : i32
    return %arg0, %arg1, %c0_i32 : i32, i32, i32
  }
}

</mosaic_0001>

<bundles_post_ra>
// kernel: discriminator_forward.8
= control target key start
LH: loop header
LB: loop body
LE: loop exit
PB: predicated region body
PF: predicated region fallthrough
CT: control target
= control target key end

     0   :  { %s1004_s12 = smov 0   ;;  %s1006_s13 = smov 0   ;;  %s1154_s0 = inlined_call_operand.vmem [shape: bf16[2,256,128], index: 0, kind: input, shape index: {}]   ;;  %s1155_s1 = inlined_call_operand.vmem [shape: bf16[128,128], index: 1, kind: input, shape index: {}]   ;;  %s1156_s2 = inlined_call_operand.vmem [shape: f32[1,128], index: 2, kind: input, shape index: {}]   ;;  %s1157_s3 = inlined_call_operand.vmem [shape: f32[2,256,128], index: 3, kind: output, shape index: {}]  }
   0x1   :  { %s1008_s14 = smov 0  }
   0x2 LB: > { %s25_s15 = sadd.s32 1, %s978_s13  ;;  %p790_p0 = scmp.ge.s32.totalorder %s982_s14, 1  ;;  %s982_s14 = sphi %s1008_s14, %s13_s14   ;;  %s978_s13 = sphi %s1006_s13, %s1159_s13   ;;  %s974_s12 = sphi %s1004_s12, %s1158_s12  }
   0x3   : > { %p27_p1 = scmp.ge.s32.totalorder %s25_s15, 2  ;;  %p158_p2 = scmp.lt.s32.totalorder %s982_s14, 3 }
   0x5   : > { %s1161_s15 = smov (%p27_p1, %s25_s15), 0  ;;  %p159_p3 = pnand %p790_p0, %p158_p2 }
   0x6   : > { %p191_p4 = scmp.lt.s32.totalorder (!%p159_p3), %s974_s12, 1 }
   0x7   : > { %162 = sbr.rel (%p159_p3) target bundleno = 275 (0x113), region = 32 }
   0xc   : > { %v936_v0 = vld [vmem:[%s1155_s1 + $0x38] sm:$0xff]   ;;  %v937_v1 = vld [vmem:[%s1155_s1 + $0x30] sm:$0xff]   ;;  %s1163_s12 = smov (!%p191_p4, %s974_s12), 1  ;;  %v938_v2 = vld [vmem:[%s1155_s1 + $0x28] sm:$0xff]  }
   0xd   : > { %848 = vmatprep.subr.bf16.mxu0 %v936_v0  ;;  %896 = vmatprep.subr.bf16.mxu1 %v936_v0  ;;  %s822_s22 = sshll.u32 %s1163_s12, 7  ;;  %v939_v3 = vld [vmem:[%s1155_s1 + $0x20] sm:$0xff]   ;;  %v940_v6 = vld [vmem:[%s1155_s1 + $0x18] sm:$0xff]   ;;  %v941_v7 = vld [vmem:[%s1155_s1 + $0x10] sm:$0xff]   ;;  %s823_s11 = sshll.u32 %s1163_s12, 8 }
   0xe   : > { %849 = vmatpush3.bf16.msra.mxu0 %v936_v0  ;;  %904 = vmatpush3.bf16.msra.mxu1 %v936_v0  ;;  %s1037_s25 = scalar_lea.vmem %s1154_s0, %s822_s22  ;;  %v942_v8 = vld [vmem:[%s1155_s1 + $0x8] sm:$0xff]   ;;  %v943_v9 = vld [vmem:[%s1155_s1] sm:$0xff]   ;;  %s1081_s18 = scalar_lea.vmem %s1157_s3, %s823_s11 }
   0xf   : > { %850 = vmatprep.subr.bf16.mxu0 %v937_v1  ;;  %897 = vmatprep.subr.bf16.mxu1 %v937_v1  ;;  %v944_v4 = vld [vmem:[%s1037_s25] sm:$0xff]   ;;  %v946_v10 = vld [vmem:[%s1037_s25 + $0x8] sm:$0xff]   ;;  %v948_v12 = vld [vmem:[%s1037_s25 + $0x10] sm:$0xff]  }
  0x10   : > { %v945_v5 = vld [vmem:[%s1037_s25 + $0x40] sm:$0xff]   ;;  %864 = vmatprep.mubr.bf16.mxu0 %v944_v4  ;;  %v947_v11 = vld [vmem:[%s1037_s25 + $0x48] sm:$0xff]   ;;  %v949_v13 = vld [vmem:[%s1037_s25 + $0x50] sm:$0xff]  }
  0x11   : > { %880 = vmatprep.mubr.bf16.mxu1 %v945_v5  ;;  %v950_v14 = vld [vmem:[%s1037_s25 + $0x18] sm:$0xff]   ;;  %v952_v16 = vld [vmem:[%s1037_s25 + $0x20] sm:$0xff]   ;;  %v954_v18 = vld [vmem:[%s1037_s25 + $0x28] sm:$0xff]  }
  0x12   : > { %851 = vmatpush3.bf16.msra.mxu0 %v937_v1  ;;  %905 = vmatpush3.bf16.msra.mxu1 %v937_v1  ;;  %v951_v15 = vld [vmem:[%s1037_s25 + $0x58] sm:$0xff]   ;;  %v953_v17 = vld [vmem:[%s1037_s25 + $0x60] sm:$0xff]   ;;  %v955_v19 = vld [vmem:[%s1037_s25 + $0x68] sm:$0xff]  }
  0x13   : > { %852 = vmatprep.subr.bf16.mxu0 %v938_v2  ;;  %898 = vmatprep.subr.bf16.mxu1 %v938_v2  ;;  %v956_v20 = vld [vmem:[%s1037_s25 + $0x30] sm:$0xff]   ;;  %v958_v22 = vld [vmem:[%s1037_s25 + $0x38] sm:$0xff]   ;;  %v1073_v24 = vld [vmem:[%s1156_s2] ss:$0 sm:$0xff] }
  0x14   : > { %v957_v21 = vld [vmem:[%s1037_s25 + $0x70] sm:$0xff]   ;;  %v959_v23 = vld [vmem:[%s1037_s25 + $0x78] sm:$0xff]  }
  0x16   : > { %853 = vmatpush3.bf16.msra.mxu0 %v938_v2  ;;  %906 = vmatpush3.bf16.msra.mxu1 %v938_v2 }
  0x17   : > { %854 = vmatprep.subr.bf16.mxu0 %v939_v3  ;;  %899 = vmatprep.subr.bf16.mxu1 %v939_v3 }
  0x1a   : > { %855 = vmatpush3.bf16.msra.mxu0 %v939_v3  ;;  %907 = vmatpush3.bf16.msra.mxu1 %v939_v3 }
  0x1b   : > { %856 = vmatprep.subr.bf16.mxu0 %v940_v6  ;;  %900 = vmatprep.subr.bf16.mxu1 %v940_v6 }
  0x1e   : > { %857 = vmatpush3.bf16.msra.mxu0 %v940_v6  ;;  %908 = vmatpush3.bf16.msra.mxu1 %v940_v6 }
  0x1f   : > { %858 = vmatprep.subr.bf16.mxu0 %v941_v7  ;;  %901 = vmatprep.subr.bf16.mxu1 %v941_v7 }
  0x22   : > { %859 = vmatpush3.bf16.msra.mxu0 %v941_v7  ;;  %909 = vmatpush3.bf16.msra.mxu1 %v941_v7 }
  0x23   : > { %860 = vmatprep.subr.bf16.mxu0 %v942_v8  ;;  %902 = vmatprep.subr.bf16.mxu1 %v942_v8 }
  0x26   : > { %861 = vmatpush3.bf16.msra.mxu0 %v942_v8  ;;  %910 = vmatpush3.bf16.msra.mxu1 %v942_v8 }
  0x27   : > { %862 = vmatprep.subr.bf16.mxu0 %v943_v9  ;;  %903 = vmatprep.subr.bf16.mxu1 %v943_v9 }
  0x2a   : > { %863 = vmatpush3.bf16.msra.mxu0 %v943_v9  ;;  %911 = vmatpush3.bf16.msra.mxu1 %v943_v9 }
  0x2d   : > { %865 = vmatmul.mubr.bf16.vlgmr.msra.gmra.mxu0 %v946_v10  ;;  %881 = vmatmul.mubr.bf16.vlgmr.msra.gmra.mxu1 %v947_v11 }
  0x2e   : > { %868 = vmatprep.mubr.bf16.mxu0 %v948_v12  ;;  %884 = vmatprep.mubr.bf16.mxu1 %v949_v13 }
  0x35   : > { %869 = vmatmul.mubr.bf16.gmra.mxu0 %v950_v14  ;;  %885 = vmatmul.mubr.bf16.gmra.mxu1 %v951_v15 }
  0x36   : > { %872 = vmatprep.mubr.bf16.mxu0 %v952_v16  ;;  %888 = vmatprep.mubr.bf16.mxu1 %v953_v17 }
  0x3d   : > { %873 = vmatmul.mubr.bf16.gmra.mxu0 %v954_v18  ;;  %889 = vmatmul.mubr.bf16.gmra.mxu1 %v955_v19 }
  0x3e   : > { %876 = vmatprep.mubr.bf16.mxu0 %v956_v20  ;;  %892 = vmatprep.mubr.bf16.mxu1 %v957_v21 }
  0x45   : > { %877 = vmatmul.mubr.bf16.gmra.mxu0 %v958_v22  ;;  %893 = vmatmul.mubr.bf16.gmra.mxu1 %v959_v23 }
  0xed   : > { %v866_v25 = vpop.f32.mrf.mxu0  ;;  %v882_v26 = vpop.f32.mrf.mxu1 }
  0xee   : > { %v453_v27 = vadd.f32 %v866_v25, %v1073_v24  ;;  %v517_v28 = vadd.f32 %v882_v26, %v1073_v24 }
  0xef   : > { %v444_v29 = vpop.f32.mrf.mxu0  ;;  %v508_v30 = vpop.f32.mrf.mxu1 }
  0xf0   : > { %vm573_vm0 = vcmp.gt.f32.partialorder %v453_v27, 0.0  ;;  %v605_v31 = vmul.f32 0.2, %v453_v27  ;;  %vm589_vm1 = vcmp.gt.f32.partialorder %v517_v28, 0.0  ;;  %v621_v32 = vmul.f32 0.2, %v517_v28 }
  0xf1   : > { %v445_v33 = vadd.f32 %v1073_v24, %v444_v29  ;;  %v509_v34 = vadd.f32 %v1073_v24, %v508_v30  ;;  %v867_v35 = vpop.f32.mrf.mxu0  ;;  %v883_v36 = vpop.f32.mrf.mxu1 }
  0xf2   : > { %v637_v37 = vsel %vm573_vm0, %v453_v27, %v605_v31  ;;  %v653_v38 = vsel %vm589_vm1, %v517_v28, %v621_v32  ;;  %v456_v39 = vadd.f32 %v867_v35, %v1073_v24  ;;  %v520_v40 = vadd.f32 %v883_v36, %v1073_v24 }
  0xf3   : > { %669 = vst [vmem:[%s1081_s18 + $0x10] sm:$0xff] %v637_v37  ;;  %685 = vst [vmem:[%s1081_s18 + $0x90] sm:$0xff] %v653_v38  ;;  %vm571_vm2 = vcmp.gt.f32.partialorder %v445_v33, 0.0  ;;  %v603_v41 = vmul.f32 0.2, %v445_v33  ;;  %vm587_vm3 = vcmp.gt.f32.partialorder %v509_v34, 0.0  ;;  %v447_v43 = vpop.f32.mrf.mxu0  ;;  %v511_v44 = vpop.f32.mrf.mxu1 }
  0xf4   : > { %v619_v42 = vmul.f32 0.2, %v509_v34  ;;  %vm574_vm4 = vcmp.gt.f32.partialorder %v456_v39, 0.0  ;;  %v606_v45 = vmul.f32 0.2, %v456_v39  ;;  %vm590_vm5 = vcmp.gt.f32.partialorder %v520_v40, 0.0 }
  0xf5   : > { %v622_v46 = vmul.f32 0.2, %v520_v40  ;;  %v635_v47 = vsel %vm571_vm2, %v445_v33, %v603_v41  ;;  %v448_v49 = vadd.f32 %v1073_v24, %v447_v43  ;;  %v512_v50 = vadd.f32 %v1073_v24, %v511_v44  ;;  %v870_v51 = vpop.f32.mrf.mxu0  ;;  %v886_v52 = vpop.f32.mrf.mxu1 }
  0xf6   : > { %v651_v48 = vsel %vm587_vm3, %v509_v34, %v619_v42  ;;  %667 = vst [vmem:[%s1081_s18] sm:$0xff] %v635_v47  ;;  %v638_v53 = vsel %vm574_vm4, %v456_v39, %v606_v45  ;;  %v469_v55 = vadd.f32 %v870_v51, %v1073_v24  ;;  %v533_v56 = vadd.f32 %v886_v52, %v1073_v24 }
  0xf7   : > { %683 = vst [vmem:[%s1081_s18 + $0x80] sm:$0xff] %v651_v48  ;;  %v654_v54 = vsel %vm590_vm5, %v520_v40, %v622_v46  ;;  %670 = vst [vmem:[%s1081_s18 + $0x18] sm:$0xff] %v638_v53  ;;  %vm572_vm6 = vcmp.gt.f32.partialorder %v448_v49, 0.0  ;;  %v604_v57 = vmul.f32 0.2, %v448_v49  ;;  %vm588_vm7 = vcmp.gt.f32.partialorder %v512_v50, 0.0  ;;  %v460_v59 = vpop.f32.mrf.mxu0  ;;  %v524_v60 = vpop.f32.mrf.mxu1 }
  0xf8   : > { %686 = vst [vmem:[%s1081_s18 + $0x98] sm:$0xff] %v654_v54  ;;  %v620_v58 = vmul.f32 0.2, %v512_v50  ;;  %vm577_vm8 = vcmp.gt.f32.partialorder %v469_v55, 0.0  ;;  %v609_v61 = vmul.f32 0.2, %v469_v55  ;;  %v461_v1 = vadd.f32 %v1073_v24, %v460_v59 }
  0xf9   : > { %vm593_vm9 = vcmp.gt.f32.partialorder %v533_v56, 0.0  ;;  %v625_v62 = vmul.f32 0.2, %v533_v56  ;;  %v636_v63 = vsel %vm572_vm6, %v448_v49, %v604_v57  ;;  %v525_v2 = vadd.f32 %v1073_v24, %v524_v60  ;;  %v871_v3 = vpop.f32.mrf.mxu0  ;;  %v887_v4 = vpop.f32.mrf.mxu1 }
  0xfa   : > { %v652_v0 = vsel %vm588_vm7, %v512_v50, %v620_v58  ;;  %668 = vst [vmem:[%s1081_s18 + $0x8] sm:$0xff] %v636_v63  ;;  %v641_v5 = vsel %vm577_vm8, %v469_v55, %v609_v61  ;;  %v472_v7 = vadd.f32 %v871_v3, %v1073_v24  ;;  %v536_v8 = vadd.f32 %v887_v4, %v1073_v24 }
  0xfb   : > { %684 = vst [vmem:[%s1081_s18 + $0x88] sm:$0xff] %v652_v0  ;;  %v657_v6 = vsel %vm593_vm9, %v533_v56, %v625_v62  ;;  %673 = vst [vmem:[%s1081_s18 + $0x30] sm:$0xff] %v641_v5  ;;  %vm575_vm10 = vcmp.gt.f32.partialorder %v461_v1, 0.0  ;;  %v607_v9 = vmul.f32 0.2, %v461_v1  ;;  %vm591_vm11 = vcmp.gt.f32.partialorder %v525_v2, 0.0  ;;  %v463_v11 = vpop.f32.mrf.mxu0  ;;  %v527_v12 = vpop.f32.mrf.mxu1 }
  0xfc   : > { %689 = vst [vmem:[%s1081_s18 + $0xb0] sm:$0xff] %v657_v6  ;;  %v623_v10 = vmul.f32 0.2, %v525_v2  ;;  %vm578_vm12 = vcmp.gt.f32.partialorder %v472_v7, 0.0  ;;  %v610_v13 = vmul.f32 0.2, %v472_v7  ;;  %v464_v17 = vadd.f32 %v1073_v24, %v463_v11 }
  0xfd   : > { %vm594_vm13 = vcmp.gt.f32.partialorder %v536_v8, 0.0  ;;  %v626_v14 = vmul.f32 0.2, %v536_v8  ;;  %v639_v15 = vsel %vm575_vm10, %v461_v1, %v607_v9  ;;  %v528_v18 = vadd.f32 %v1073_v24, %v527_v12  ;;  %v874_v19 = vpop.f32.mrf.mxu0  ;;  %v890_v20 = vpop.f32.mrf.mxu1 }
  0xfe   : > { %v655_v16 = vsel %vm591_vm11, %v525_v2, %v623_v10  ;;  %671 = vst [vmem:[%s1081_s18 + $0x20] sm:$0xff] %v639_v15  ;;  %v642_v21 = vsel %vm578_vm12, %v472_v7, %v610_v13  ;;  %v485_v23 = vadd.f32 %v874_v19, %v1073_v24  ;;  %v549_v25 = vadd.f32 %v890_v20, %v1073_v24 }
  0xff   : > { %687 = vst [vmem:[%s1081_s18 + $0xa0] sm:$0xff] %v655_v16  ;;  %v658_v22 = vsel %vm594_vm13, %v536_v8, %v626_v14  ;;  %674 = vst [vmem:[%s1081_s18 + $0x38] sm:$0xff] %v642_v21  ;;  %vm576_vm14 = vcmp.gt.f32.partialorder %v464_v17, 0.0  ;;  %v608_v26 = vmul.f32 0.2, %v464_v17  ;;  %vm592_vm15 = vcmp.gt.f32.partialorder %v528_v18, 0.0  ;;  %v476_v28 = vpop.f32.mrf.mxu0  ;;  %v540_v29 = vpop.f32.mrf.mxu1 }
 0x100   : > { %690 = vst [vmem:[%s1081_s18 + $0xb8] sm:$0xff] %v658_v22  ;;  %v624_v27 = vmul.f32 0.2, %v528_v18  ;;  %vm581_vm0 = vcmp.gt.f32.partialorder %v485_v23, 0.0  ;;  %v613_v30 = vmul.f32 0.2, %v485_v23  ;;  %v477_v34 = vadd.f32 %v1073_v24, %v476_v28 }
 0x101   : > { %vm597_vm1 = vcmp.gt.f32.partialorder %v549_v25, 0.0  ;;  %v629_v31 = vmul.f32 0.2, %v549_v25  ;;  %v640_v32 = vsel %vm576_vm14, %v464_v17, %v608_v26  ;;  %v541_v35 = vadd.f32 %v1073_v24, %v540_v29  ;;  %v875_v36 = vpop.f32.mrf.mxu0  ;;  %v891_v37 = vpop.f32.mrf.mxu1 }
 0x102   : > { %v656_v33 = vsel %vm592_vm15, %v528_v18, %v624_v27  ;;  %672 = vst [vmem:[%s1081_s18 + $0x28] sm:$0xff] %v640_v32  ;;  %v645_v38 = vsel %vm581_vm0, %v485_v23, %v613_v30  ;;  %v488_v40 = vadd.f32 %v875_v36, %v1073_v24  ;;  %v552_v41 = vadd.f32 %v891_v37, %v1073_v24 }
 0x103   : > { %688 = vst [vmem:[%s1081_s18 + $0xa8] sm:$0xff] %v656_v33  ;;  %v661_v39 = vsel %vm597_vm1, %v549_v25, %v629_v31  ;;  %677 = vst [vmem:[%s1081_s18 + $0x50] sm:$0xff] %v645_v38  ;;  %vm579_vm2 = vcmp.gt.f32.partialorder %v477_v34, 0.0  ;;  %v611_v42 = vmul.f32 0.2, %v477_v34  ;;  %vm595_vm3 = vcmp.gt.f32.partialorder %v541_v35, 0.0  ;;  %v479_v44 = vpop.f32.mrf.mxu0  ;;  %v543_v45 = vpop.f32.mrf.mxu1 }
 0x104   : > { %693 = vst [vmem:[%s1081_s18 + $0xd0] sm:$0xff] %v661_v39  ;;  %v627_v43 = vmul.f32 0.2, %v541_v35  ;;  %vm582_vm4 = vcmp.gt.f32.partialorder %v488_v40, 0.0  ;;  %v614_v46 = vmul.f32 0.2, %v488_v40  ;;  %v480_v50 = vadd.f32 %v1073_v24, %v479_v44 }
 0x105   : > { %vm598_vm5 = vcmp.gt.f32.partialorder %v552_v41, 0.0  ;;  %v630_v47 = vmul.f32 0.2, %v552_v41  ;;  %v643_v48 = vsel %vm579_vm2, %v477_v34, %v611_v42  ;;  %v544_v51 = vadd.f32 %v1073_v24, %v543_v45  ;;  %v878_v52 = vpop.f32.mrf.mxu0  ;;  %v894_v53 = vpop.f32.mrf.mxu1 }
 0x106   : > { %v659_v49 = vsel %vm595_vm3, %v541_v35, %v627_v43  ;;  %675 = vst [vmem:[%s1081_s18 + $0x40] sm:$0xff] %v643_v48  ;;  %v646_v54 = vsel %vm582_vm4, %v488_v40, %v614_v46  ;;  %v501_v56 = vadd.f32 %v878_v52, %v1073_v24  ;;  %v565_v57 = vadd.f32 %v894_v53, %v1073_v24 }
 0x107   : > { %691 = vst [vmem:[%s1081_s18 + $0xc0] sm:$0xff] %v659_v49  ;;  %v662_v55 = vsel %vm598_vm5, %v552_v41, %v630_v47  ;;  %678 = vst [vmem:[%s1081_s18 + $0x58] sm:$0xff] %v646_v54  ;;  %vm580_vm6 = vcmp.gt.f32.partialorder %v480_v50, 0.0  ;;  %v612_v58 = vmul.f32 0.2, %v480_v50  ;;  %vm596_vm7 = vcmp.gt.f32.partialorder %v544_v51, 0.0  ;;  %v492_v60 = vpop.f32.mrf.mxu0  ;;  %v556_v61 = vpop.f32.mrf.mxu1 }
 0x108   : > { %694 = vst [vmem:[%s1081_s18 + $0xd8] sm:$0xff] %v662_v55  ;;  %v628_v59 = vmul.f32 0.2, %v544_v51  ;;  %vm585_vm8 = vcmp.gt.f32.partialorder %v501_v56, 0.0  ;;  %v617_v62 = vmul.f32 0.2, %v501_v56  ;;  %v493_v2 = vadd.f32 %v1073_v24, %v492_v60 }
 0x109   : > { %vm601_vm9 = vcmp.gt.f32.partialorder %v565_v57, 0.0  ;;  %v633_v63 = vmul.f32 0.2, %v565_v57  ;;  %v644_v0 = vsel %vm580_vm6, %v480_v50, %v612_v58  ;;  %v557_v3 = vadd.f32 %v1073_v24, %v556_v61  ;;  %v879_v4 = vpop.f32.mrf.mxu0  ;;  %v895_v5 = vpop.f32.mrf.mxu1 }
 0x10a   : > { %v660_v1 = vsel %vm596_vm7, %v544_v51, %v628_v59  ;;  %676 = vst [vmem:[%s1081_s18 + $0x48] sm:$0xff] %v644_v0  ;;  %v649_v6 = vsel %vm585_vm8, %v501_v56, %v617_v62  ;;  %v504_v8 = vadd.f32 %v879_v4, %v1073_v24  ;;  %v568_v9 = vadd.f32 %v895_v5, %v1073_v24 }
 0x10b   : > { %692 = vst [vmem:[%s1081_s18 + $0xc8] sm:$0xff] %v660_v1  ;;  %v665_v7 = vsel %vm601_vm9, %v565_v57, %v633_v63  ;;  %681 = vst [vmem:[%s1081_s18 + $0x70] sm:$0xff] %v649_v6  ;;  %vm583_vm10 = vcmp.gt.f32.partialorder %v493_v2, 0.0  ;;  %v615_v10 = vmul.f32 0.2, %v493_v2  ;;  %vm599_vm11 = vcmp.gt.f32.partialorder %v557_v3, 0.0  ;;  %v495_v12 = vpop.f32.mrf.mxu0  ;;  %v559_v13 = vpop.f32.mrf.mxu1 }
 0x10c   : > { %697 = vst [vmem:[%s1081_s18 + $0xf0] sm:$0xff] %v665_v7  ;;  %v631_v11 = vmul.f32 0.2, %v557_v3  ;;  %vm586_vm12 = vcmp.gt.f32.partialorder %v504_v8, 0.0  ;;  %v618_v14 = vmul.f32 0.2, %v504_v8  ;;  %v496_v18 = vadd.f32 %v1073_v24, %v495_v12 }
 0x10d   : > { %vm602_vm13 = vcmp.gt.f32.partialorder %v568_v9, 0.0  ;;  %v634_v15 = vmul.f32 0.2, %v568_v9  ;;  %v647_v16 = vsel %vm583_vm10, %v493_v2, %v615_v10  ;;  %v560_v19 = vadd.f32 %v1073_v24, %v559_v13 }
 0x10e   : > { %v663_v17 = vsel %vm599_vm11, %v557_v3, %v631_v11  ;;  %679 = vst [vmem:[%s1081_s18 + $0x60] sm:$0xff] %v647_v16  ;;  %v650_v20 = vsel %vm586_vm12, %v504_v8, %v618_v14  ;;  %vm584_vm14 = vcmp.gt.f32.partialorder %v496_v18, 0.0  ;;  %v616_v22 = vmul.f32 0.2, %v496_v18 }
 0x10f   : > { %695 = vst [vmem:[%s1081_s18 + $0xe0] sm:$0xff] %v663_v17  ;;  %v666_v21 = vsel %vm602_vm13, %v568_v9, %v634_v15  ;;  %682 = vst [vmem:[%s1081_s18 + $0x78] sm:$0xff] %v650_v20  ;;  %vm600_vm15 = vcmp.gt.f32.partialorder %v560_v19, 0.0  ;;  %v632_v23 = vmul.f32 0.2, %v560_v19 }
 0x110   : > { %698 = vst [vmem:[%s1081_s18 + $0xf8] sm:$0xff] %v666_v21  ;;  %v648_v25 = vsel %vm584_vm14, %v496_v18, %v616_v22 }
 0x111   : > { %v664_v26 = vsel %vm600_vm15, %v560_v19, %v632_v23  ;;  %680 = vst [vmem:[%s1081_s18 + $0x68] sm:$0xff] %v648_v25 }
 0x112   : > { %696 = vst [vmem:[%s1081_s18 + $0xe8] sm:$0xff] %v664_v26 }
 0x113 PF: > { %s13_s14 = sadd.s32 1, %s982_s14   ;;  %s1158_s12 = smov %s978_s13 }
 0x114   : > { %p10_p5 = scmp.ge.s32.totalorder %s13_s14, 4   ;;  %s1159_s13 = smov %s1161_s15 }
 0x116   :  { %12 = sbr.rel (!%p10_p5) target bundleno = 2 (0x2), region = 62 }

// kernel: discriminator_forward.9
= control target key start
LH: loop header
LB: loop body
LE: loop exit
PB: predicated region body
PF: predicated region fallthrough
CT: control target
= control target key end

     0   :  { %s811_s18 = smov 0   ;;  %s813_s19 = smov 0   ;;  %s899_s0 = inlined_call_operand.vmem [shape: bf16[2,64,128], index: 0, kind: input, shape index: {}]   ;;  %s900_s1 = inlined_call_operand.vmem [shape: bf16[128,128], index: 1, kind: input, shape index: {}]   ;;  %s901_s2 = inlined_call_operand.vmem [shape: f32[1,128], index: 2, kind: input, shape index: {}]   ;;  %s902_s3 = inlined_call_operand.vmem [shape: f32[2,64,128], index: 3, kind: output, shape index: {0}]   ;;  %s903_s4 = inlined_call_operand.vmem [shape: f32[2,1,128], index: 4, kind: output, shape index: {1}]   ;;  %s904_s5 = inlined_call_operand.vmem [shape: f32[2,1,128], index: 5, kind: output, shape index: {2}]  }
   0x1   :  { %s815_s20 = smov 0  }
   0x2 LB: > { %s28_s21 = sadd.s32 1, %s774_s19  ;;  %p645_p0 = scmp.ge.s32.totalorder %s778_s20, 1  ;;  %s778_s20 = sphi %s815_s20, %s16_s20   ;;  %s774_s19 = sphi %s813_s19, %s906_s19   ;;  %s770_s18 = sphi %s811_s18, %s905_s18  }
   0x3   : > { %p30_p1 = scmp.ge.s32.totalorder %s28_s21, 2  ;;  %p213_p2 = scmp.lt.s32.totalorder %s778_s20, 3 }
   0x5   : > { %s908_s21 = smov (%p30_p1, %s28_s21), 0  ;;  %p214_p3 = pnand %p645_p0, %p213_p2 }
   0x6   : > { %p256_p4 = scmp.lt.s32.totalorder (!%p214_p3), %s770_s18, 1 }
   0x7   : > { %217 = sbr.rel (%p214_p3) target bundleno = 277 (0x115), region = 32 }
   0xc   : > { %v744_v0 = vld [vmem:[%s900_s1 + $0x38] sm:$0xff]   ;;  %v745_v1 = vld [vmem:[%s900_s1 + $0x30] sm:$0xff]   ;;  %s910_s18 = smov (!%p256_p4, %s770_s18), 1  ;;  %v746_v2 = vld [vmem:[%s900_s1 + $0x28] sm:$0xff]   ;;  %v780_v12 = vmov 0.0  }
   0xd   : > { %679 = vmatprep.subr.bf16.mxu0 %v744_v0  ;;  %703 = vmatprep.subr.bf16.mxu1 %v744_v0  ;;  %s665_s28 = sshll.u32 %s910_s18, 5  ;;  %v747_v3 = vld [vmem:[%s900_s1 + $0x20] sm:$0xff]   ;;  %v748_v6 = vld [vmem:[%s900_s1 + $0x18] sm:$0xff]   ;;  %v749_v7 = vld [vmem:[%s900_s1 + $0x10] sm:$0xff]   ;;  %s869_s23 = scalar_lea.vmem %s903_s4, %s910_s18 }
   0xe   : > { %680 = vmatpush3.bf16.msra.mxu0 %v744_v0  ;;  %711 = vmatpush3.bf16.msra.mxu1 %v744_v0  ;;  %s844_s6 = scalar_lea.vmem %s899_s0, %s665_s28  ;;  %v750_v8 = vld [vmem:[%s900_s1 + $0x8] sm:$0xff]   ;;  %v751_v9 = vld [vmem:[%s900_s1] sm:$0xff]   ;;  %s875_s26 = scalar_lea.vmem %s904_s5, %s910_s18  ;;  %462 = vst [vmem:[%s869_s23] sm:$0x1] %v780_v12 }
   0xf   : > { %681 = vmatprep.subr.bf16.mxu0 %v745_v1  ;;  %704 = vmatprep.subr.bf16.mxu1 %v745_v1  ;;  %v752_v4 = vld [vmem:[%s844_s6] sm:$0xff]   ;;  %v754_v5 = vld [vmem:[%s844_s6 + $0x10] sm:$0xff]   ;;  %v753_v10 = vld [vmem:[%s844_s6 + $0x8] sm:$0xff]   ;;  %463 = vst [vmem:[%s875_s26] sm:$0x1] %v780_v12  ;;  %s666_s27 = sshll.u32 %s910_s18, 6 }
  0x10   : > { %695 = vmatprep.mubr.bf16.mxu0 %v752_v4  ;;  %699 = vmatprep.mubr.bf16.mxu1 %v754_v5  ;;  %v755_v11 = vld [vmem:[%s844_s6 + $0x18] sm:$0xff]   ;;  %v650_v13 = vld [vmem:[%s901_s2] ss:$0 sm:$0xff]  ;;  %s273_s7 = scalar_lea.vmem %s902_s3, %s666_s27 }
  0x12   : > { %682 = vmatpush3.bf16.msra.mxu0 %v745_v1  ;;  %712 = vmatpush3.bf16.msra.mxu1 %v745_v1 }
  0x13   : > { %683 = vmatprep.subr.bf16.mxu0 %v746_v2  ;;  %705 = vmatprep.subr.bf16.mxu1 %v746_v2 }
  0x15   : > { %v464_v61 = vld [vmem:[%s869_s23] sm:$0x1] }
  0x16   : > { %684 = vmatpush3.bf16.msra.mxu0 %v746_v2  ;;  %713 = vmatpush3.bf16.msra.mxu1 %v746_v2  ;;  %v480_v0 = vld [vmem:[%s875_s26] sm:$0x1] }
  0x17   : > { %685 = vmatprep.subr.bf16.mxu0 %v747_v3  ;;  %706 = vmatprep.subr.bf16.mxu1 %v747_v3 }
  0x1a   : > { %686 = vmatpush3.bf16.msra.mxu0 %v747_v3  ;;  %714 = vmatpush3.bf16.msra.mxu1 %v747_v3 }
  0x1b   : > { %687 = vmatprep.subr.bf16.mxu0 %v748_v6  ;;  %707 = vmatprep.subr.bf16.mxu1 %v748_v6 }
  0x1e   : > { %688 = vmatpush3.bf16.msra.mxu0 %v748_v6  ;;  %715 = vmatpush3.bf16.msra.mxu1 %v748_v6 }
  0x1f   : > { %689 = vmatprep.subr.bf16.mxu0 %v749_v7  ;;  %708 = vmatprep.subr.bf16.mxu1 %v749_v7 }
  0x22   : > { %690 = vmatpush3.bf16.msra.mxu0 %v749_v7  ;;  %716 = vmatpush3.bf16.msra.mxu1 %v749_v7 }
  0x23   : > { %691 = vmatprep.subr.bf16.mxu0 %v750_v8  ;;  %709 = vmatprep.subr.bf16.mxu1 %v750_v8 }
  0x26   : > { %692 = vmatpush3.bf16.msra.mxu0 %v750_v8  ;;  %717 = vmatpush3.bf16.msra.mxu1 %v750_v8 }
  0x27   : > { %693 = vmatprep.subr.bf16.mxu0 %v751_v9  ;;  %710 = vmatprep.subr.bf16.mxu1 %v751_v9 }
  0x2a   : > { %694 = vmatpush3.bf16.msra.mxu0 %v751_v9  ;;  %718 = vmatpush3.bf16.msra.mxu1 %v751_v9 }
  0x2d   : > { %696 = vmatmul.mubr.bf16.vlgmr.msra.gmra.mxu0 %v753_v10  ;;  %700 = vmatmul.mubr.bf16.vlgmr.msra.gmra.mxu1 %v755_v11 }
  0xed   : > { %v697_v14 = vpop.f32.mrf.mxu0  ;;  %v701_v15 = vpop.f32.mrf.mxu1 }
  0xee   : > { %v428_v16 = vadd.f32 %v697_v14, %v650_v13  ;;  %v444_v17 = vadd.f32 %v701_v15, %v650_v13 }
  0xef   : > { %v419_v18 = vpop.f32.mrf.mxu0  ;;  %v435_v19 = vpop.f32.mrf.mxu1 }
  0xf0   : > { %452 = vst [vmem:[%s273_s7 + $0x10] sm:$0xff] %v428_v16  ;;  %v420_v20 = vadd.f32 %v650_v13, %v419_v18  ;;  %456 = vst [vmem:[%s273_s7 + $0x30] sm:$0xff] %v444_v17  ;;  %v436_v21 = vadd.f32 %v650_v13, %v435_v19  ;;  %v483_v33 = vmul.f32 %v428_v16, %v428_v16 }
  0xf1   : > { %v698_v22 = vpop.f32.mrf.mxu0  ;;  %v702_v23 = vpop.f32.mrf.mxu1  ;;  %v487_v45 = vmul.f32 %v444_v17, %v444_v17 }
  0xf2   : > { %450 = vst [vmem:[%s273_s7] sm:$0xff] %v420_v20  ;;  %v431_v24 = vadd.f32 %v698_v22, %v650_v13  ;;  %454 = vst [vmem:[%s273_s7 + $0x20] sm:$0xff] %v436_v21  ;;  %v447_v25 = vadd.f32 %v702_v23, %v650_v13  ;;  %v481_v30 = vmul.f32 %v420_v20, %v420_v20 }
  0xf3   : > { %v422_v26 = vpop.f32.mrf.mxu0  ;;  %v438_v27 = vpop.f32.mrf.mxu1  ;;  %v485_v39 = vmul.f32 %v436_v21, %v436_v21 }
  0xf4   : > { %453 = vst [vmem:[%s273_s7 + $0x18] sm:$0xff] %v431_v24  ;;  %v423_v28 = vadd.f32 %v650_v13, %v422_v26  ;;  %457 = vst [vmem:[%s273_s7 + $0x38] sm:$0xff] %v447_v25  ;;  %v439_v29 = vadd.f32 %v650_v13, %v438_v27  ;;  %v484_v36 = vmul.f32 %v431_v24, %v431_v24 }
  0xf5   : > { %v488_v48 = vmul.f32 %v447_v25, %v447_v25 }
  0xf6   : > { %451 = vst [vmem:[%s273_s7 + $0x8] sm:$0xff] %v423_v28  ;;  %v465_v31 = vadd.f32 %v423_v28, %v420_v20  ;;  %v482_v32 = vmul.f32 %v423_v28, %v423_v28  ;;  %455 = vst [vmem:[%s273_s7 + $0x28] sm:$0xff] %v439_v29  ;;  %v486_v43 = vmul.f32 %v439_v29, %v439_v29 }
  0xf8   : > { %v466_v34 = vadd.f32 %v465_v31, %v428_v16  ;;  %v489_v35 = vadd.f32 %v482_v32, %v481_v30 }
  0xfa   : > { %v490_v37 = vadd.f32 %v489_v35, %v483_v33  ;;  %v467_v38 = vadd.f32 %v466_v34, %v431_v24 }
  0xfc   : > { %v468_v40 = vadd.f32 %v467_v38, %v436_v21  ;;  %v491_v41 = vadd.f32 %v490_v37, %v484_v36 }
  0xfe   : > { %v469_v42 = vadd.f32 %v468_v40, %v439_v29  ;;  %v492_v44 = vadd.f32 %v491_v41, %v485_v39 }
 0x100   : > { %v470_v46 = vadd.f32 %v469_v42, %v444_v17  ;;  %v493_v47 = vadd.f32 %v492_v44, %v486_v43 }
 0x102   : > { %v471_v49 = vadd.f32 %v470_v46, %v447_v25  ;;  %v494_v50 = vadd.f32 %v493_v47, %v487_v45 }
 0x104   : > { %v472_v51 = vrot.slane %v471_v49, 4  ;;  %v495_v52 = vadd.f32 %v494_v50, %v488_v48 }
 0x106   : > { %v473_v53 = vadd.f32 %v472_v51, %v471_v49  ;;  %v496_v54 = vrot.slane %v495_v52, 4 }
 0x108   : > { %v474_v55 = vrot.slane %v473_v53, 2  ;;  %v497_v56 = vadd.f32 %v496_v54, %v495_v52 }
 0x10a   : > { %v475_v57 = vadd.f32 %v474_v55, %v473_v53  ;;  %v498_v58 = vrot.slane %v497_v56, 2 }
 0x10c   : > { %v476_v59 = vrot.slane %v475_v57, 1  ;;  %v499_v60 = vadd.f32 %v498_v58, %v497_v56 }
 0x10e   : > { %v477_v62 = vadd.f32 %v476_v59, %v475_v57  ;;  %v500_v63 = vrot.slane %v499_v60, 1 }
 0x110   : > { %v478_v1 = vadd.f32 %v477_v62, %v464_v61  ;;  %v501_v2 = vadd.f32 %v500_v63, %v499_v60 }
 0x112   : > { %479 = vst [vmem:[%s869_s23] sm:$0x1] %v478_v1  ;;  %v502_v3 = vadd.f32 %v501_v2, %v480_v0 }
 0x114   : > { %503 = vst [vmem:[%s875_s26] sm:$0x1] %v502_v3 }
 0x115 PF: > { %s16_s20 = sadd.s32 1, %s778_s20   ;;  %s905_s18 = smov %s774_s19 }
 0x116   : > { %p13_p5 = scmp.ge.s32.totalorder %s16_s20, 4   ;;  %s906_s19 = smov %s908_s21 }
 0x118   :  { %15 = sbr.rel (!%p13_p5) target bundleno = 2 (0x2), region = 90 }

// kernel: discriminator_forward.10
= control target key start
LH: loop header
LB: loop body
LE: loop exit
PB: predicated region body
PF: predicated region fallthrough
CT: control target
= control target key end

     0   :  { %s503_s12 = smov 0   ;;  %s505_s13 = smov 0   ;;  %s561_s0 = inlined_call_operand.vmem [shape: f32[2,64,128], index: 0, kind: input, shape index: {}]   ;;  %s562_s1 = inlined_call_operand.vmem [shape: f32[2,1,128], index: 1, kind: input, shape index: {}]   ;;  %s563_s2 = inlined_call_operand.vmem [shape: f32[2,1,128], index: 2, kind: input, shape index: {}]   ;;  %s564_s3 = inlined_call_operand.vmem [shape: f32[2,64,128], index: 3, kind: output, shape index: {}]  }
   0x1   :  { %s507_s14 = smov 0  }
   0x2 LB: > { %s25_s15 = sadd.s32 1, %s477_s13  ;;  %p424_p0 = scmp.ge.s32.totalorder %s481_s14, 1  ;;  %s481_s14 = sphi %s507_s14, %s13_s14   ;;  %s477_s13 = sphi %s505_s13, %s566_s13   ;;  %s473_s12 = sphi %s503_s12, %s565_s12  }
   0x3   : > { %p27_p1 = scmp.ge.s32.totalorder %s25_s15, 2  ;;  %p174_p2 = scmp.lt.s32.totalorder %s481_s14, 3 }
   0x5   : > { %s568_s15 = smov (%p27_p1, %s25_s15), 0  ;;  %p175_p3 = pnand %p424_p0, %p174_p2 }
   0x6   : > { %p213_p4 = scmp.lt.s32.totalorder (!%p175_p3), %s473_s12, 1 }
   0x7   : > { %178 = sbr.rel (%p175_p3) target bundleno = 52 (0x34), region = 32 }
   0xc   : > { %s570_s12 = smov (!%p213_p4, %s473_s12), 1  ;;  %v254_v7 = vlaneseq }
   0xd   : > { %s224_s18 = scalar_lea.vmem %s562_s1, %s570_s12  ;;  %s227_s21 = scalar_lea.vmem %s563_s2, %s570_s12 }
   0xe   : > { %v246_v0 = vld [vmem:[%s224_s18] sm:$0x1]  ;;  %v255_v9 = vshrl.u32 %v254_v7, 7  ;;  %s431_s22 = sshll.u32 %s570_s12, 6 }
   0xf   : > { %v247_v1 = vmul.f32 0.015625, %v246_v0  ;;  %v248_v2 = vld [vmem:[%s227_s21] sm:$0x1]  ;;  %s220_s25 = scalar_lea.vmem %s561_s0, %s431_s22  ;;  %s542_s28 = scalar_lea.vmem %s564_s3, %s431_s22 }
  0x10   : > { %v249_v3 = vmul.f32 0.015625, %v248_v2  ;;  %v256_v10 = vsub.s32 0, %v255_v9  ;;  %v238_v11 = vld [vmem:[%s220_s25] sm:$0xff]  ;;  %v239_v13 = vld [vmem:[%s220_s25 + $0x8] sm:$0xff]  ;;  %v240_v14 = vld [vmem:[%s220_s25 + $0x10] sm:$0xff] }
  0x11   : > { %v250_v4 = vmul.f32 %v247_v1, %v247_v1  ;;  %v241_v15 = vld [vmem:[%s220_s25 + $0x18] sm:$0xff]  ;;  %v242_v16 = vld [vmem:[%s220_s25 + $0x20] sm:$0xff]  ;;  %v243_v17 = vld [vmem:[%s220_s25 + $0x28] sm:$0xff] }
  0x12   : > { %v257_v12 = vrot.slane %v247_v1, %v256_v10  ;;  %v244_v18 = vld [vmem:[%s220_s25 + $0x30] sm:$0xff]  ;;  %v245_v19 = vld [vmem:[%s220_s25 + $0x38] sm:$0xff] }
  0x13   : > { %v251_v5 = vsub.f32 %v249_v3, %v250_v4 }
  0x14   : > { %v259_v20 = vsub.f32 %v238_v11, %v257_v12  ;;  %v260_v21 = vsub.f32 %v239_v13, %v257_v12  ;;  %v261_v22 = vsub.f32 %v240_v14, %v257_v12  ;;  %v262_v23 = vsub.f32 %v241_v15, %v257_v12 }
  0x15   : > { %v252_v6 = vmax.f32 %v251_v5, 0.0  ;;  %v263_v25 = vsub.f32 %v242_v16, %v257_v12  ;;  %v264_v26 = vsub.f32 %v243_v17, %v257_v12  ;;  %v265_v27 = vsub.f32 %v244_v18, %v257_v12 }
  0x16   : > { %v266_v28 = vsub.f32 %v245_v19, %v257_v12 }
  0x17   : > { %v267_v8 = vadd.f32 1e-05, %v252_v6 }
  0x19   : > { %457 = vrsqrt.f32 %v267_v8 }
  0x26   : > { %v458_v24 = vpop.eup %457 }
  0x27   : > { %v273_v29 = vrot.slane %v458_v24, %v256_v10 }
  0x29   : > { %v275_v30 = vmul.f32 %v273_v29, %v259_v20  ;;  %v276_v31 = vmul.f32 %v273_v29, %v260_v21  ;;  %v277_v32 = vmul.f32 %v273_v29, %v261_v22  ;;  %v278_v33 = vmul.f32 %v273_v29, %v262_v23 }
  0x2a   : > { %v279_v34 = vmul.f32 %v273_v29, %v263_v25  ;;  %v280_v35 = vmul.f32 %v273_v29, %v264_v26  ;;  %v281_v36 = vmul.f32 %v273_v29, %v265_v27  ;;  %v282_v37 = vmul.f32 %v273_v29, %v266_v28 }
  0x2b   : > { %vm283_vm0 = vcmp.gt.f32.partialorder %v275_v30, 0.0  ;;  %v291_v38 = vmul.f32 0.2, %v275_v30  ;;  %vm284_vm1 = vcmp.gt.f32.partialorder %v276_v31, 0.0  ;;  %v292_v39 = vmul.f32 0.2, %v276_v31 }
  0x2c   : > { %vm285_vm2 = vcmp.gt.f32.partialorder %v277_v32, 0.0  ;;  %v293_v40 = vmul.f32 0.2, %v277_v32  ;;  %vm286_vm3 = vcmp.gt.f32.partialorder %v278_v33, 0.0  ;;  %v294_v41 = vmul.f32 0.2, %v278_v33 }
  0x2d   : > { %v299_v42 = vsel %vm283_vm0, %v275_v30, %v291_v38  ;;  %v300_v43 = vsel %vm284_vm1, %v276_v31, %v292_v39  ;;  %vm287_vm4 = vcmp.gt.f32.partialorder %v279_v34, 0.0  ;;  %v295_v44 = vmul.f32 0.2, %v279_v34 }
  0x2e   : > { %307 = vst [vmem:[%s542_s28] sm:$0xff] %v299_v42  ;;  %308 = vst [vmem:[%s542_s28 + $0x8] sm:$0xff] %v300_v43  ;;  %v301_v45 = vsel %vm285_vm2, %v277_v32, %v293_v40  ;;  %v302_v46 = vsel %vm286_vm3, %v278_v33, %v294_v41  ;;  %vm288_vm5 = vcmp.gt.f32.partialorder %v280_v35, 0.0  ;;  %v296_v47 = vmul.f32 0.2, %v280_v35 }
  0x2f   : > { %309 = vst [vmem:[%s542_s28 + $0x10] sm:$0xff] %v301_v45  ;;  %310 = vst [vmem:[%s542_s28 + $0x18] sm:$0xff] %v302_v46  ;;  %v303_v48 = vsel %vm287_vm4, %v279_v34, %v295_v44  ;;  %vm289_vm6 = vcmp.gt.f32.partialorder %v281_v36, 0.0  ;;  %v297_v49 = vmul.f32 0.2, %v281_v36  ;;  %vm290_vm7 = vcmp.gt.f32.partialorder %v282_v37, 0.0 }
  0x30   : > { %311 = vst [vmem:[%s542_s28 + $0x20] sm:$0xff] %v303_v48  ;;  %v304_v50 = vsel %vm288_vm5, %v280_v35, %v296_v47  ;;  %v298_v51 = vmul.f32 0.2, %v282_v37 }
  0x31   : > { %312 = vst [vmem:[%s542_s28 + $0x28] sm:$0xff] %v304_v50  ;;  %v305_v52 = vsel %vm289_vm6, %v281_v36, %v297_v49 }
  0x32   : > { %313 = vst [vmem:[%s542_s28 + $0x30] sm:$0xff] %v305_v52  ;;  %v306_v53 = vsel %vm290_vm7, %v282_v37, %v298_v51 }
  0x33   : > { %314 = vst [vmem:[%s542_s28 + $0x38] sm:$0xff] %v306_v53 }
  0x34 PF: > { %s13_s14 = sadd.s32 1, %s481_s14   ;;  %s565_s12 = smov %s477_s13 }
  0x35   : > { %p10_p5 = scmp.ge.s32.totalorder %s13_s14, 4   ;;  %s566_s13 = smov %s568_s15 }
  0x37   :  { %12 = sbr.rel (!%p10_p5) target bundleno = 2 (0x2), region = 68 }

// kernel: discriminator_forward.12
= control target key start
LH: loop header
LB: loop body
LE: loop exit
PB: predicated region body
PF: predicated region fallthrough
CT: control target
= control target key end

     0   :  { %s461_s12 = smov 0   ;;  %s463_s13 = smov 0   ;;  %s500_s0 = inlined_call_operand.vmem [shape: f32[2,16,128], index: 0, kind: input, shape index: {}]   ;;  %s501_s1 = inlined_call_operand.vmem [shape: f32[2,1,128], index: 1, kind: input, shape index: {}]   ;;  %s502_s2 = inlined_call_operand.vmem [shape: f32[2,1,128], index: 2, kind: input, shape index: {}]   ;;  %s503_s3 = inlined_call_operand.vmem [shape: f32[2,16,128], index: 3, kind: output, shape index: {}]  }
   0x1   :  { %s465_s14 = smov 0  }
   0x2 LB: > { %s25_s15 = sadd.s32 1, %s435_s13  ;;  %p382_p0 = scmp.ge.s32.totalorder %s439_s14, 1  ;;  %s439_s14 = sphi %s465_s14, %s13_s14   ;;  %s435_s13 = sphi %s463_s13, %s505_s13   ;;  %s431_s12 = sphi %s461_s12, %s504_s12  }
   0x3   : > { %p27_p1 = scmp.ge.s32.totalorder %s25_s15, 2  ;;  %p174_p2 = scmp.lt.s32.totalorder %s439_s14, 3 }
   0x5   : > { %s507_s15 = smov (%p27_p1, %s25_s15), 0  ;;  %p175_p3 = pnand %p382_p0, %p174_p2 }
   0x6   : > { %p213_p4 = scmp.lt.s32.totalorder (!%p175_p3), %s431_s12, 1 }
   0x7   : > { %178 = sbr.rel (%p175_p3) target bundleno = 47 (0x2f), region = 32 }
   0xc   : > { %s509_s12 = smov (!%p213_p4, %s431_s12), 1  ;;  %v248_v7 = vlaneseq }
   0xd   : > { %s224_s18 = scalar_lea.vmem %s501_s1, %s509_s12  ;;  %s227_s21 = scalar_lea.vmem %s502_s2, %s509_s12 }
   0xe   : > { %v240_v0 = vld [vmem:[%s224_s18] sm:$0x1]  ;;  %v249_v9 = vshrl.u32 %v248_v7, 7  ;;  %s389_s22 = sshll.u32 %s509_s12, 4 }
   0xf   : > { %v241_v1 = vmul.f32 0.0625, %v240_v0  ;;  %v242_v2 = vld [vmem:[%s227_s21] sm:$0x1]  ;;  %s220_s25 = scalar_lea.vmem %s500_s0, %s389_s22  ;;  %s236_s28 = scalar_lea.vmem %s503_s3, %s389_s22 }
  0x10   : > { %v243_v3 = vmul.f32 0.0625, %v242_v2  ;;  %v250_v10 = vsub.s32 0, %v249_v9  ;;  %v238_v12 = vld [vmem:[%s220_s25] sm:$0xff]  ;;  %v239_v13 = vld [vmem:[%s220_s25 + $0x8] sm:$0xff] }
  0x11   : > { %v244_v4 = vmul.f32 %v241_v1, %v241_v1 }
  0x12   : > { %v251_v11 = vrot.slane %v241_v1, %v250_v10 }
  0x13   : > { %v245_v5 = vsub.f32 %v243_v3, %v244_v4 }
  0x14   : > { %v253_v14 = vsub.f32 %v238_v12, %v251_v11  ;;  %v254_v15 = vsub.f32 %v239_v13, %v251_v11 }
  0x15   : > { %v246_v6 = vmax.f32 %v245_v5, 0.0 }
  0x17   : > { %v255_v8 = vadd.f32 1e-05, %v246_v6 }
  0x19   : > { %415 = vrsqrt.f32 %v255_v8 }
  0x26   : > { %v416_v16 = vpop.eup %415 }
  0x27   : > { %v261_v17 = vrot.slane %v416_v16, %v250_v10 }
  0x29   : > { %v263_v18 = vmul.f32 %v261_v17, %v253_v14  ;;  %v264_v19 = vmul.f32 %v261_v17, %v254_v15 }
  0x2b   : > { %vm265_vm0 = vcmp.gt.f32.partialorder %v263_v18, 0.0  ;;  %v267_v20 = vmul.f32 0.2, %v263_v18  ;;  %vm266_vm1 = vcmp.gt.f32.partialorder %v264_v19, 0.0  ;;  %v268_v21 = vmul.f32 0.2, %v264_v19 }
  0x2d   : > { %v269_v22 = vsel %vm265_vm0, %v263_v18, %v267_v20  ;;  %v270_v23 = vsel %vm266_vm1, %v264_v19, %v268_v21 }
  0x2e   : > { %271 = vst [vmem:[%s236_s28] sm:$0xff] %v269_v22  ;;  %272 = vst [vmem:[%s236_s28 + $0x8] sm:$0xff] %v270_v23 }
  0x2f PF: > { %s13_s14 = sadd.s32 1, %s439_s14   ;;  %s504_s12 = smov %s435_s13 }
  0x30   : > { %p10_p5 = scmp.ge.s32.totalorder %s13_s14, 4   ;;  %s505_s13 = smov %s507_s15 }
  0x32   :  { %12 = sbr.rel (!%p10_p5) target bundleno = 2 (0x2), region = 68 }

// kernel: discriminator_forward.11
= control target key start
LH: loop header
LB: loop body
LE: loop exit
PB: predicated region body
PF: predicated region fallthrough
CT: control target
= control target key end

     0   :  { %s796_s18 = smov 0   ;;  %s798_s19 = smov 0   ;;  %s901_s0 = inlined_call_operand.vmem [shape: bf16[2,16,256], index: 0, kind: input, shape index: {}]   ;;  %s902_s1 = inlined_call_operand.vmem [shape: bf16[256,128], index: 1, kind: input, shape index: {}]   ;;  %s903_s2 = inlined_call_operand.vmem [shape: f32[1,128], index: 2, kind: input, shape index: {}]   ;;  %s904_s3 = inlined_call_operand.vmem [shape: f32[2,16,128], index: 3, kind: output, shape index: {0}]   ;;  %s905_s4 = inlined_call_operand.vmem [shape: f32[2,1,128], index: 4, kind: output, shape index: {1}]   ;;  %s906_s5 = inlined_call_operand.vmem [shape: f32[2,1,128], index: 5, kind: output, shape index: {2}]  }
   0x1   :  { %s800_s20 = smov 0  }
   0x2 LB: > { %s28_s21 = sadd.s32 1, %s759_s19  ;;  %p647_p0 = scmp.ge.s32.totalorder %s763_s20, 1  ;;  %s763_s20 = sphi %s800_s20, %s16_s20   ;;  %s759_s19 = sphi %s798_s19, %s908_s19   ;;  %s755_s18 = sphi %s796_s18, %s907_s18  }
   0x3   : > { %p30_p1 = scmp.ge.s32.totalorder %s28_s21, 2  ;;  %p214_p2 = scmp.lt.s32.totalorder %s763_s20, 3 }
   0x5   : > { %s910_s21 = smov (%p30_p1, %s28_s21), 0  ;;  %p215_p3 = pnand %p647_p0, %p214_p2 }
   0x6   : > { %p258_p4 = scmp.lt.s32.totalorder (!%p215_p3), %s755_s18, 1 }
   0x7   : > { %218 = sbr.rel (%p215_p3) target bundleno = 267 (0x10b), region = 32 }
   0xc   : > { %v722_v0 = vld [vmem:[%s902_s1 + $0x78] sm:$0xff]   ;;  %v724_v2 = vld [vmem:[%s902_s1 + $0x70] sm:$0xff]   ;;  %s912_s18 = smov (!%p258_p4, %s755_s18), 1  ;;  %v726_v4 = vld [vmem:[%s902_s1 + $0x68] sm:$0xff]   ;;  %v765_v5 = vmov 0.0  }
   0xd   : > { %v723_v1 = vld [vmem:[%s902_s1 + $0x38] sm:$0xff]   ;;  %675 = vmatprep.subr.bf16.mxu0 %v722_v0  ;;  %v725_v3 = vld [vmem:[%s902_s1 + $0x30] sm:$0xff]   ;;  %s835_s9 = scalar_lea.vmem %s905_s4, %s912_s18  ;;  %s842_s12 = scalar_lea.vmem %s906_s5, %s912_s18  ;;  %v727_v6 = vld [vmem:[%s902_s1 + $0x28] sm:$0xff]  }
   0xe   : > { %676 = vmatpush3.bf16.msra.mxu0 %v723_v1  ;;  %479 = vst [vmem:[%s835_s9] sm:$0x1] %v765_v5  ;;  %480 = vst [vmem:[%s842_s12] sm:$0x1] %v765_v5  ;;  %v728_v7 = vld [vmem:[%s902_s1 + $0x60] sm:$0xff]   ;;  %s673_s23 = sshll.u32 %s912_s18, 4  ;;  %v730_v9 = vld [vmem:[%s902_s1 + $0x58] sm:$0xff]  }
   0xf   : > { %677 = vmatprep.subr.bf16.mxu0 %v724_v2  ;;  %v729_v8 = vld [vmem:[%s902_s1 + $0x20] sm:$0xff]   ;;  %s266_s28 = scalar_lea.vmem %s901_s0, %s673_s23  ;;  %v731_v10 = vld [vmem:[%s902_s1 + $0x18] sm:$0xff]   ;;  %v732_v11 = vld [vmem:[%s902_s1 + $0x50] sm:$0xff]   ;;  %s276_s29 = scalar_lea.vmem %s904_s3, %s673_s23 }
  0x10   : > { %v740_v12 = vld [vmem:[%s266_s28 + $0x4] ss:$8 sps:$4 sm:$0xff]   ;;  %v733_v13 = vld [vmem:[%s902_s1 + $0x10] sm:$0xff]   ;;  %v738_v18 = vld [vmem:[%s266_s28] ss:$8 sps:$4 sm:$0xff]  }
  0x11   : > { %464 = vmatprep.mubr.bf16.mxu0 %v740_v12  ;;  %v734_v14 = vld [vmem:[%s902_s1 + $0x48] sm:$0xff]   ;;  %v736_v16 = vld [vmem:[%s902_s1 + $0x40] sm:$0xff]  }
  0x12   : > { %678 = vmatpush3.bf16.msra.mxu0 %v725_v3  ;;  %v735_v15 = vld [vmem:[%s902_s1 + $0x8] sm:$0xff]   ;;  %v737_v17 = vld [vmem:[%s902_s1] sm:$0xff]  }
  0x13   : > { %679 = vmatprep.subr.bf16.mxu0 %v726_v4  ;;  %v652_v20 = vld [vmem:[%s903_s2] ss:$0 sm:$0xff] }
  0x15   : > { %v481_v41 = vld [vmem:[%s835_s9] sm:$0x1] }
  0x16   : > { %680 = vmatpush3.bf16.msra.mxu0 %v727_v6  ;;  %v491_v44 = vld [vmem:[%s842_s12] sm:$0x1] }
  0x17   : > { %681 = vmatprep.subr.bf16.mxu0 %v728_v7 }
  0x1a   : > { %682 = vmatpush3.bf16.msra.mxu0 %v729_v8 }
  0x1b   : > { %683 = vmatprep.subr.bf16.mxu0 %v730_v9 }
  0x1e   : > { %684 = vmatpush3.bf16.msra.mxu0 %v731_v10 }
  0x1f   : > { %685 = vmatprep.subr.bf16.mxu0 %v732_v11 }
  0x22   : > { %686 = vmatpush3.bf16.msra.mxu0 %v733_v13 }
  0x23   : > { %687 = vmatprep.subr.bf16.mxu0 %v734_v14 }
  0x26   : > { %688 = vmatpush3.bf16.msra.mxu0 %v735_v15 }
  0x27   : > { %689 = vmatprep.subr.bf16.mxu0 %v736_v16 }
  0x2a   : > { %690 = vmatpush3.bf16.msra.mxu0 %v737_v17 }
  0x2d   : > { %465 = vmatmul.mubr.bf16.vlgmr.msra.gmra.mxu0 %v738_v18 }
  0xed   : > { %v691_v19 = vpop.f32.mrf.mxu0 }
  0xef   : > { %v692_v21 = vpop.f32.mrf.mxu0 }
  0xf0   : > { %v693_v22 = vadd.f32 %v692_v21, %v691_v19 }
  0xf1   : > { %v694_v23 = vpop.f32.mrf.mxu0 }
  0xf2   : > { %v467_v24 = vadd.f32 %v693_v22, %v652_v20 }
  0xf3   : > { %v695_v25 = vpop.f32.mrf.mxu0 }
  0xf4   : > { %473 = vst [vmem:[%s276_s29] sm:$0xff] %v467_v24  ;;  %v696_v26 = vadd.f32 %v695_v25, %v694_v23  ;;  %v492_v28 = vmul.f32 %v467_v24, %v467_v24 }
  0xf6   : > { %v470_v27 = vadd.f32 %v696_v26, %v652_v20 }
  0xf8   : > { %474 = vst [vmem:[%s276_s29 + $0x8] sm:$0xff] %v470_v27  ;;  %v482_v29 = vadd.f32 %v470_v27, %v467_v24  ;;  %v493_v30 = vmul.f32 %v470_v27, %v470_v27 }
  0xfa   : > { %v483_v31 = vrot.slane %v482_v29, 4  ;;  %v494_v32 = vadd.f32 %v493_v30, %v492_v28 }
  0xfc   : > { %v484_v33 = vadd.f32 %v483_v31, %v482_v29  ;;  %v495_v34 = vrot.slane %v494_v32, 4 }
  0xfe   : > { %v485_v35 = vrot.slane %v484_v33, 2  ;;  %v496_v36 = vadd.f32 %v495_v34, %v494_v32 }
 0x100   : > { %v486_v37 = vadd.f32 %v485_v35, %v484_v33  ;;  %v497_v38 = vrot.slane %v496_v36, 2 }
 0x102   : > { %v487_v39 = vrot.slane %v486_v37, 1  ;;  %v498_v40 = vadd.f32 %v497_v38, %v496_v36 }
 0x104   : > { %v488_v42 = vadd.f32 %v487_v39, %v486_v37  ;;  %v499_v43 = vrot.slane %v498_v40, 1 }
 0x106   : > { %v489_v45 = vadd.f32 %v488_v42, %v481_v41  ;;  %v500_v46 = vadd.f32 %v499_v43, %v498_v40 }
 0x108   : > { %490 = vst [vmem:[%s835_s9] sm:$0x1] %v489_v45  ;;  %v501_v47 = vadd.f32 %v500_v46, %v491_v44 }
 0x10a   : > { %502 = vst [vmem:[%s842_s12] sm:$0x1] %v501_v47 }
 0x10b PF: > { %s16_s20 = sadd.s32 1, %s763_s20   ;;  %s907_s18 = smov %s759_s19 }
 0x10c   : > { %p13_p5 = scmp.ge.s32.totalorder %s16_s20, 4   ;;  %s908_s19 = smov %s910_s21 }
 0x10e   :  { %15 = sbr.rel (!%p13_p5) target bundleno = 2 (0x2), region = 90 }

// kernel: discriminator_forward.14
= control target key start
LH: loop header
LB: loop body
LE: loop exit
PB: predicated region body
PF: predicated region fallthrough
CT: control target
= control target key end

     0   :  { %s424_s12 = smov 0   ;;  %s426_s13 = smov 0   ;;  %s463_s0 = inlined_call_operand.vmem [shape: f32[2,4,128], index: 0, kind: input, shape index: {}]   ;;  %s464_s1 = inlined_call_operand.vmem [shape: f32[2,1,128], index: 1, kind: input, shape index: {}]   ;;  %s465_s2 = inlined_call_operand.vmem [shape: f32[2,1,128], index: 2, kind: input, shape index: {}]   ;;  %s466_s3 = inlined_call_operand.vmem [shape: f32[2,4,128], index: 3, kind: output, shape index: {}]  }
   0x1   :  { %s428_s14 = smov 0  }
   0x2 LB: > { %s25_s15 = sadd.s32 1, %s398_s13  ;;  %p349_p0 = scmp.ge.s32.totalorder %s402_s14, 1  ;;  %s402_s14 = sphi %s428_s14, %s13_s14   ;;  %s398_s13 = sphi %s426_s13, %s468_s13   ;;  %s394_s12 = sphi %s424_s12, %s467_s12  }
   0x3   : > { %p27_p1 = scmp.ge.s32.totalorder %s25_s15, 2  ;;  %p171_p2 = scmp.lt.s32.totalorder %s402_s14, 3 }
   0x5   : > { %s470_s15 = smov (%p27_p1, %s25_s15), 0  ;;  %p172_p3 = pnand %p349_p0, %p171_p2 }
   0x6   : > { %p205_p4 = scmp.lt.s32.totalorder (!%p172_p3), %s394_s12, 1 }
   0x7   : > { %175 = sbr.rel (%p172_p3) target bundleno = 47 (0x2f), region = 32 }
   0xc   : > { %s472_s12 = smov (!%p205_p4, %s394_s12), 1  ;;  %v234_v7 = vlaneseq }
   0xd   : > { %s214_s18 = scalar_lea.vmem %s464_s1, %s472_s12  ;;  %s217_s21 = scalar_lea.vmem %s465_s2, %s472_s12 }
   0xe   : > { %v226_v0 = vld [vmem:[%s214_s18] sm:$0x1]  ;;  %v235_v9 = vshrl.u32 %v234_v7, 7  ;;  %s350_s22 = sshll.u32 %s472_s12, 2 }
   0xf   : > { %v227_v1 = vmul.f32 0.25, %v226_v0  ;;  %v228_v2 = vld [vmem:[%s217_s21] sm:$0x1]  ;;  %s211_s25 = scalar_lea.vmem %s463_s0, %s350_s22  ;;  %s224_s28 = scalar_lea.vmem %s466_s3, %s350_s22 }
  0x10   : > { %v229_v3 = vmul.f32 0.25, %v228_v2  ;;  %v236_v10 = vsub.s32 0, %v235_v9  ;;  %v225_v12 = vld [vmem:[%s211_s25] sm:$0xf] }
  0x11   : > { %v230_v4 = vmul.f32 %v227_v1, %v227_v1 }
  0x12   : > { %v237_v11 = vrot.slane %v227_v1, %v236_v10 }
  0x13   : > { %v231_v5 = vsub.f32 %v229_v3, %v230_v4 }
  0x14   : > { %v239_v13 = vsub.f32 %v225_v12, %v237_v11 }
  0x15   : > { %v232_v6 = vmax.f32 %v231_v5, 0.0 }
  0x17   : > { %v240_v8 = vadd.f32 1e-05, %v232_v6 }
  0x19   : > { %378 = vrsqrt.f32 %v240_v8 }
  0x26   : > { %v379_v14 = vpop.eup %378 }
  0x27   : > { %v246_v15 = vrot.slane %v379_v14, %v236_v10 }
  0x29   : > { %v248_v16 = vmul.f32 %v246_v15, %v239_v13 }
  0x2b   : > { %vm249_vm0 = vcmp.gt.f32.partialorder %v248_v16, 0.0  ;;  %v250_v17 = vmul.f32 0.2, %v248_v16 }
  0x2d   : > { %v251_v18 = vsel %vm249_vm0, %v248_v16, %v250_v17 }
  0x2e   : > { %252 = vst [vmem:[%s224_s28] sm:$0xf] %v251_v18 }
  0x2f PF: > { %s13_s14 = sadd.s32 1, %s402_s14   ;;  %s467_s12 = smov %s398_s13 }
  0x30   : > { %p10_p5 = scmp.ge.s32.totalorder %s13_s14, 4   ;;  %s468_s13 = smov %s470_s15 }
  0x32   :  { %12 = sbr.rel (!%p10_p5) target bundleno = 2 (0x2), region = 68 }

// kernel: discriminator_forward.13
= control target key start
LH: loop header
LB: loop body
LE: loop exit
PB: predicated region body
PF: predicated region fallthrough
CT: control target
= control target key end

     0   :  { %s1003_s18 = smov 0   ;;  %s1005_s19 = smov 0   ;;  %s1161_s0 = inlined_call_operand.vmem [shape: bf16[2,4,512], index: 0, kind: input, shape index: {}]   ;;  %s1162_s1 = inlined_call_operand.vmem [shape: bf16[512,128], index: 1, kind: input, shape index: {}]   ;;  %s1163_s2 = inlined_call_operand.vmem [shape: f32[1,128], index: 2, kind: input, shape index: {}]   ;;  %s1164_s3 = inlined_call_operand.vmem [shape: f32[2,4,128], index: 3, kind: output, shape index: {0}]   ;;  %s1165_s4 = inlined_call_operand.vmem [shape: f32[2,1,128], index: 4, kind: output, shape index: {1}]   ;;  %s1166_s5 = inlined_call_operand.vmem [shape: f32[2,1,128], index: 5, kind: output, shape index: {2}]  }
   0x1   :  { %s1007_s20 = smov 0  }
   0x2 LB: > { %s28_s21 = sadd.s32 1, %s965_s19  ;;  %p804_p0 = scmp.ge.s32.totalorder %s969_s20, 1  ;;  %s969_s20 = sphi %s1007_s20, %s16_s20   ;;  %s965_s19 = sphi %s1005_s19, %s1168_s19   ;;  %s961_s18 = sphi %s1003_s18, %s1167_s18  }
   0x3   : > { %p30_p1 = scmp.ge.s32.totalorder %s28_s21, 2  ;;  %p212_p2 = scmp.lt.s32.totalorder %s969_s20, 3 }
   0x5   : > { %s1170_s21 = smov (%p30_p1, %s28_s21), 0  ;;  %p213_p3 = pnand %p804_p0, %p212_p2 }
   0x6   : > { %p252_p4 = scmp.lt.s32.totalorder (!%p213_p3), %s961_s18, 1 }
   0x7   : > { %216 = sbr.rel (%p213_p3) target bundleno = 265 (0x109), region = 32 }
   0xc   : > { %v914_v0 = vld [vmem:[%s1162_s1 + $0x78] sm:$0xff]   ;;  %v918_v4 = vld [vmem:[%s1162_s1 + $0x70] sm:$0xff]   ;;  %v922_v8 = vld [vmem:[%s1162_s1 + $0x68] sm:$0xff]   ;;  %s1172_s18 = smov (!%p252_p4, %s961_s18), 1  ;;  %v352_v30 = vlaneseq  ;;  %v971_v34 = vmov 1983009808  }
   0xd   : > { %v915_v1 = vld [vmem:[%s1162_s1 + $0xf8] sm:$0xff]   ;;  %844 = vmatprep.subr.bf16.mxu0 %v914_v0  ;;  %v919_v5 = vld [vmem:[%s1162_s1 + $0xf0] sm:$0xff]   ;;  %v923_v9 = vld [vmem:[%s1162_s1 + $0xe8] sm:$0xff]   ;;  %s843_s9 = sshll.u32 %s1172_s18, 3  ;;  %v350_v35 = vunpack.c.l.s4 %v971_v34  ;;  %s1131_s29 = scalar_lea.vmem %s1165_s4, %s1172_s18  ;;  %v972_v44 = vmov 0.0   ;;  %vm649_vm0 = vcmask 1043456  }
   0xe   : > { %v916_v2 = vld [vmem:[%s1162_s1 + $0x38] sm:$0xff]   ;;  %866 = vmatprep.subr.bf16.mxu1 %v915_v1  ;;  %v920_v6 = vld [vmem:[%s1162_s1 + $0x30] sm:$0xff]   ;;  %v924_v10 = vld [vmem:[%s1162_s1 + $0x28] sm:$0xff]   ;;  %s260_s22 = scalar_lea.vmem %s1161_s0, %s843_s9  ;;  %v353_v36 = vshrl.u32 %v352_v30, 7  ;;  %s1137_s7 = scalar_lea.vmem %s1166_s5, %s1172_s18  ;;  %646 = vst [vmem:[%s1131_s29] sm:$0x1] %v972_v44 }
   0xf   : > { %v917_v3 = vld [vmem:[%s1162_s1 + $0xb8] sm:$0xff]   ;;  %845 = vmatpush3.bf16.msra.mxu0 %v916_v2  ;;  %v921_v7 = vld [vmem:[%s1162_s1 + $0xb0] sm:$0xff]   ;;  %v925_v11 = vld [vmem:[%s1162_s1 + $0xa8] sm:$0xff]   ;;  %v351_v37 = vunpack.c.0.s8 %v350_v35  ;;  %647 = vst [vmem:[%s1137_s7] sm:$0x1] %v972_v44  ;;  %s807_s10 = sshll.u32 %s1172_s18, 2 }
  0x10   : > { %867 = vmatpush3.bf16.msra.mxu1 %v917_v3  ;;  %846 = vmatprep.subr.bf16.mxu0 %v918_v4  ;;  %v926_v12 = vld [vmem:[%s1162_s1 + $0x60] sm:$0xff]   ;;  %v930_v16 = vld [vmem:[%s1162_s1 + $0x58] sm:$0xff]   ;;  %v934_v20 = vld [vmem:[%s1162_s1 + $0x50] sm:$0xff]   ;;  %s267_s13 = scalar_lea.vmem %s1164_s3, %s807_s10 }
  0x11   : > { %868 = vmatprep.subr.bf16.mxu1 %v919_v5  ;;  %v927_v13 = vld [vmem:[%s1162_s1 + $0xe0] sm:$0xff]   ;;  %v931_v17 = vld [vmem:[%s1162_s1 + $0xd8] sm:$0xff]   ;;  %v935_v21 = vld [vmem:[%s1162_s1 + $0xd0] sm:$0xff]   ;;  %v354_v39 = vsub.s32 %v351_v37, %v353_v36 }
  0x12   : > { %v928_v14 = vld [vmem:[%s1162_s1 + $0x20] sm:$0xff]   ;;  %v932_v18 = vld [vmem:[%s1162_s1 + $0x18] sm:$0xff]   ;;  %v936_v22 = vld [vmem:[%s1162_s1 + $0x10] sm:$0xff]  }
  0x13   : > { %847 = vmatpush3.bf16.msra.mxu0 %v920_v6  ;;  %v929_v15 = vld [vmem:[%s1162_s1 + $0xa0] sm:$0xff]   ;;  %v933_v19 = vld [vmem:[%s1162_s1 + $0x98] sm:$0xff]   ;;  %v937_v23 = vld [vmem:[%s1162_s1 + $0x90] sm:$0xff]  }
  0x14   : > { %869 = vmatpush3.bf16.msra.mxu1 %v921_v7  ;;  %848 = vmatprep.subr.bf16.mxu0 %v922_v8  ;;  %v938_v24 = vld [vmem:[%s1162_s1 + $0x48] sm:$0xff]   ;;  %v942_v28 = vld [vmem:[%s1162_s1 + $0x40] sm:$0xff]  }
  0x15   : > { %870 = vmatprep.subr.bf16.mxu1 %v923_v9  ;;  %v939_v25 = vld [vmem:[%s1162_s1 + $0xc8] sm:$0xff]   ;;  %v943_v29 = vld [vmem:[%s1162_s1 + $0xc0] sm:$0xff]  }
  0x16   : > { %v940_v26 = vld [vmem:[%s1162_s1 + $0x8] sm:$0xff]   ;;  %v944_v31 = vld [vmem:[%s1162_s1] sm:$0xff]  }
  0x17   : > { %849 = vmatpush3.bf16.msra.mxu0 %v924_v10  ;;  %v941_v27 = vld [vmem:[%s1162_s1 + $0x88] sm:$0xff]   ;;  %v945_v32 = vld [vmem:[%s1162_s1 + $0x80] sm:$0xff]  }
  0x18   : > { %871 = vmatpush3.bf16.msra.mxu1 %v925_v11  ;;  %850 = vmatprep.subr.bf16.mxu0 %v926_v12  ;;  %v275_v33 = vld [vmem:[%s260_s22] sm:$0xff] }
  0x19   : > { %872 = vmatprep.subr.bf16.mxu1 %v927_v13  ;;  %v348_v38 = vcombine.high %v275_v33, %v275_v33  ;;  %v355_v40 = vrot.slane %v275_v33, %v354_v39  ;;  %v808_v47 = vld [vmem:[%s1163_s2] ss:$0 sm:$0xff] }
  0x1a   : > { %v648_v6 = vld [vmem:[%s1131_s29] sm:$0x1] }
  0x1b   : > { %851 = vmatpush3.bf16.msra.mxu0 %v928_v14  ;;  %v362_v41 = vrot.slane %v348_v38, %v354_v39  ;;  %v363_v42 = vcombine.high %v355_v40, %v355_v40  ;;  %v659_v9 = vld [vmem:[%s1137_s7] sm:$0x1] }
  0x1c   : > { %873 = vmatpush3.bf16.msra.mxu1 %v929_v15  ;;  %852 = vmatprep.subr.bf16.mxu0 %v930_v16 }
  0x1d   : > { %874 = vmatprep.subr.bf16.mxu1 %v931_v17  ;;  %v364_v43 = vcombine.high %v362_v41, %v362_v41  ;;  %593 = vmatprep.mubr.bf16.mxu0 %v363_v42 }
  0x1f   : > { %853 = vmatpush3.bf16.msra.mxu0 %v932_v18  ;;  %633 = vmatprep.mubr.bf16.mxu1 %v364_v43 }
  0x20   : > { %875 = vmatpush3.bf16.msra.mxu1 %v933_v19  ;;  %854 = vmatprep.subr.bf16.mxu0 %v934_v20 }
  0x21   : > { %876 = vmatprep.subr.bf16.mxu1 %v935_v21 }
  0x23   : > { %855 = vmatpush3.bf16.msra.mxu0 %v936_v22 }
  0x24   : > { %877 = vmatpush3.bf16.msra.mxu1 %v937_v23  ;;  %856 = vmatprep.subr.bf16.mxu0 %v938_v24 }
  0x25   : > { %878 = vmatprep.subr.bf16.mxu1 %v939_v25 }
  0x27   : > { %857 = vmatpush3.bf16.msra.mxu0 %v940_v26 }
  0x28   : > { %879 = vmatpush3.bf16.msra.mxu1 %v941_v27  ;;  %858 = vmatprep.subr.bf16.mxu0 %v942_v28 }
  0x29   : > { %880 = vmatprep.subr.bf16.mxu1 %v943_v29 }
  0x2b   : > { %859 = vmatpush3.bf16.msra.mxu0 %v944_v31 }
  0x2c   : > { %881 = vmatpush3.bf16.msra.mxu1 %v945_v32 }
  0x2e   : > { %594 = vmatmul.mubr.bf16.vlgmr.msra.gmra.mxu0 %v355_v40 }
  0x2f   : > { %634 = vmatmul.mubr.bf16.vlgmr.msra.gmra.mxu1 %v362_v41 }
  0xee   : > { %v860_v45 = vpop.f32.mrf.mxu0 }
  0xef   : > { %v882_v46 = vpop.f32.mrf.mxu1 }
  0xf0   : > { %v861_v48 = vpop.f32.mrf.mxu0 }
  0xf1   : > { %v883_v49 = vpop.f32.mrf.mxu1  ;;  %v862_v50 = vadd.f32 %v861_v48, %v860_v45 }
  0xf2   : > { %v863_v51 = vpop.f32.mrf.mxu0  ;;  %v884_v54 = vadd.f32 %v883_v49, %v882_v46 }
  0xf3   : > { %v885_v52 = vpop.f32.mrf.mxu1  ;;  %v596_v53 = vadd.f32 %v862_v50, %v808_v47 }
  0xf4   : > { %v864_v55 = vpop.f32.mrf.mxu0 }
  0xf5   : > { %v886_v56 = vpop.f32.mrf.mxu1  ;;  %v636_v57 = vadd.f32 %v884_v54, %v596_v53 }
  0xf7   : > { %641 = vst [vmem:[%s267_s13] sm:$0xf] %v636_v57  ;;  %v650_v58 = vsel %vm649_vm0, %v636_v57, 0.0  ;;  %v660_v59 = vmul.f32 %v636_v57, %v636_v57 }
  0xf8   : > { %v651_v60 = vrot.slane %v650_v58, 4 }
  0xf9   : > { %v661_v61 = vsel %vm649_vm0, %v660_v59, 0.0 }
  0xfa   : > { %v652_v62 = vadd.f32 %v651_v60, %v650_v58  ;;  %v662_v63 = vrot.slane %v661_v61, 4 }
  0xfc   : > { %v653_v0 = vrot.slane %v652_v62, 2  ;;  %v663_v1 = vadd.f32 %v662_v63, %v661_v61 }
  0xfe   : > { %v654_v2 = vadd.f32 %v653_v0, %v652_v62  ;;  %v664_v3 = vrot.slane %v663_v1, 2 }
 0x100   : > { %v655_v4 = vrot.slane %v654_v2, 1  ;;  %v665_v5 = vadd.f32 %v664_v3, %v663_v1 }
 0x102   : > { %v656_v7 = vadd.f32 %v655_v4, %v654_v2  ;;  %v666_v8 = vrot.slane %v665_v5, 1 }
 0x104   : > { %v657_v10 = vadd.f32 %v656_v7, %v648_v6  ;;  %v667_v11 = vadd.f32 %v666_v8, %v665_v5 }
 0x106   : > { %658 = vst [vmem:[%s1131_s29] sm:$0x1] %v657_v10  ;;  %v668_v12 = vadd.f32 %v667_v11, %v659_v9 }
 0x108   : > { %669 = vst [vmem:[%s1137_s7] sm:$0x1] %v668_v12 }
 0x109 PF: > { %s16_s20 = sadd.s32 1, %s969_s20   ;;  %s1167_s18 = smov %s965_s19 }
 0x10a   : > { %p13_p5 = scmp.ge.s32.totalorder %s16_s20, 4   ;;  %s1168_s19 = smov %s1170_s21 }
 0x10c   :  { %15 = sbr.rel (!%p13_p5) target bundleno = 2 (0x2), region = 90 }

// kernel: discriminator_forward.15
= control target key start
LH: loop header
LB: loop body
LE: loop exit
PB: predicated region body
PF: predicated region fallthrough
CT: control target
= control target key end

     0   :  { %s1298_s12 = smov 0   ;;  %s1300_s13 = smov 0   ;;  %s1547_s0 = inlined_call_operand.vmem [shape: bf16[2,1,1024], index: 0, kind: input, shape index: {}]   ;;  %s1548_s1 = inlined_call_operand.vmem [shape: bf16[1024,128], index: 1, kind: input, shape index: {}]   ;;  %s1549_s2 = inlined_call_operand.vmem [shape: f32[1,128], index: 2, kind: input, shape index: {}]   ;;  %s1550_s3 = inlined_call_operand.vmem [shape: f32[2,1,128], index: 3, kind: output, shape index: {}]  }
   0x1   :  { %s1302_s14 = smov 0  }
   0x2 LB: > { %s25_s15 = sadd.s32 1, %s1271_s13  ;;  %p1007_p0 = scmp.ge.s32.totalorder %s1275_s14, 1  ;;  %s1275_s14 = sphi %s1302_s14, %s13_s14   ;;  %s1271_s13 = sphi %s1300_s13, %s1552_s13   ;;  %s1267_s12 = sphi %s1298_s12, %s1551_s12  }
   0x3   : > { %p27_p1 = scmp.ge.s32.totalorder %s25_s15, 2  ;;  %p156_p2 = scmp.lt.s32.totalorder %s1275_s14, 3 }
   0x5   : > { %s1554_s15 = smov (%p27_p1, %s25_s15), 0  ;;  %p157_p3 = pnand %p1007_p0, %p156_p2 }
   0x6   : > { %p184_p4 = scmp.lt.s32.totalorder (!%p157_p3), %s1267_s12, 1 }
   0x7   : > { %160 = sbr.rel (%p157_p3) target bundleno = 280 (0x118), region = 32 }
   0xc   : > { %v1188_v0 = vld [vmem:[%s1548_s1 + $0x78] sm:$0xff]   ;;  %v1192_v4 = vld [vmem:[%s1548_s1 + $0x70] sm:$0xff]   ;;  %v1196_v8 = vld [vmem:[%s1548_s1 + $0x68] sm:$0xff]   ;;  %s1556_s12 = smov (!%p184_p4, %s1267_s12), 1  ;;  %v334_v28 = vlaneseq  ;;  %v1277_v36 = vmov 1966171168  }
   0xd   : > { %v1189_v1 = vld [vmem:[%s1548_s1 + $0xf8] sm:$0xff]   ;;  %1075 = vmatprep.subr.bf16.mxu0 %v1188_v0  ;;  %v1193_v5 = vld [vmem:[%s1548_s1 + $0xf0] sm:$0xff]   ;;  %v1197_v9 = vld [vmem:[%s1548_s1 + $0xe8] sm:$0xff]   ;;  %s1008_s24 = sshll.u32 %s1556_s12, 3  ;;  %v332_v37 = vunpack.c.l.s4 %v1277_v36  ;;  %s197_s10 = scalar_lea.vmem %s1550_s3, %s1556_s12 }
   0xe   : > { %v1190_v2 = vld [vmem:[%s1548_s1 + $0x38] sm:$0xff]   ;;  %1097 = vmatprep.subr.bf16.mxu1 %v1189_v1  ;;  %v1194_v6 = vld [vmem:[%s1548_s1 + $0x30] sm:$0xff]   ;;  %v1198_v10 = vld [vmem:[%s1548_s1 + $0x28] sm:$0xff]   ;;  %s191_s6 = scalar_lea.vmem %s1547_s0, %s1008_s24  ;;  %v335_v33 = vshrl.u32 %v334_v28, 7 }
   0xf   : > { %v1191_v3 = vld [vmem:[%s1548_s1 + $0xb8] sm:$0xff]   ;;  %1076 = vmatpush3.bf16.msra.mxu0 %v1190_v2  ;;  %v1195_v7 = vld [vmem:[%s1548_s1 + $0xb0] sm:$0xff]   ;;  %v1199_v11 = vld [vmem:[%s1548_s1 + $0xa8] sm:$0xff]   ;;  %v333_v40 = vunpack.c.0.s8 %v332_v37 }
  0x10   : > { %1098 = vmatpush3.bf16.msra.mxu1 %v1191_v3  ;;  %1077 = vmatprep.subr.bf16.mxu0 %v1192_v4  ;;  %v1200_v12 = vld [vmem:[%s1548_s1 + $0x60] sm:$0xff]   ;;  %v1204_v16 = vld [vmem:[%s1548_s1 + $0x58] sm:$0xff]   ;;  %v1208_v20 = vld [vmem:[%s1548_s1 + $0x50] sm:$0xff]  }
  0x11   : > { %1099 = vmatprep.subr.bf16.mxu1 %v1193_v5  ;;  %v1201_v13 = vld [vmem:[%s1548_s1 + $0xe0] sm:$0xff]   ;;  %v1205_v17 = vld [vmem:[%s1548_s1 + $0xd8] sm:$0xff]   ;;  %v1209_v21 = vld [vmem:[%s1548_s1 + $0xd0] sm:$0xff]   ;;  %v1428_v41 = vsub.s32 %v333_v40, %v335_v33 }
  0x12   : > { %v1202_v14 = vld [vmem:[%s1548_s1 + $0x20] sm:$0xff]   ;;  %v1206_v18 = vld [vmem:[%s1548_s1 + $0x18] sm:$0xff]   ;;  %v1210_v22 = vld [vmem:[%s1548_s1 + $0x10] sm:$0xff]  }
  0x13   : > { %1078 = vmatpush3.bf16.msra.mxu0 %v1194_v6  ;;  %v1203_v15 = vld [vmem:[%s1548_s1 + $0xa0] sm:$0xff]   ;;  %v1207_v19 = vld [vmem:[%s1548_s1 + $0x98] sm:$0xff]   ;;  %v1211_v23 = vld [vmem:[%s1548_s1 + $0x90] sm:$0xff]  }
  0x14   : > { %1100 = vmatpush3.bf16.msra.mxu1 %v1195_v7  ;;  %1079 = vmatprep.subr.bf16.mxu0 %v1196_v8  ;;  %v1212_v24 = vld [vmem:[%s1548_s1 + $0x48] sm:$0xff]   ;;  %v1216_v29 = vld [vmem:[%s1548_s1 + $0x40] sm:$0xff]   ;;  %v1221_v35 = vld [vmem:[%s1548_s1 + $0x178] sm:$0xff]  }
  0x15   : > { %1101 = vmatprep.subr.bf16.mxu1 %v1197_v9  ;;  %v1213_v25 = vld [vmem:[%s1548_s1 + $0xc8] sm:$0xff]   ;;  %v1217_v30 = vld [vmem:[%s1548_s1 + $0xc0] sm:$0xff]   ;;  %v1222_v38 = vld [vmem:[%s1548_s1 + $0x1f8] sm:$0xff]  }
  0x16   : > { %v1214_v26 = vld [vmem:[%s1548_s1 + $0x8] sm:$0xff]   ;;  %v1218_v31 = vld [vmem:[%s1548_s1] sm:$0xff]   ;;  %v1223_v48 = vld [vmem:[%s1548_s1 + $0x138] sm:$0xff]  }
  0x17   : > { %1080 = vmatpush3.bf16.msra.mxu0 %v1198_v10  ;;  %v1215_v27 = vld [vmem:[%s1548_s1 + $0x88] sm:$0xff]   ;;  %v1219_v32 = vld [vmem:[%s1548_s1 + $0x80] sm:$0xff]   ;;  %v1225_v51 = vld [vmem:[%s1548_s1 + $0x170] sm:$0xff]  }
  0x18   : > { %1102 = vmatpush3.bf16.msra.mxu1 %v1199_v11  ;;  %1081 = vmatprep.subr.bf16.mxu0 %v1200_v12  ;;  %v199_v34 = vld [vmem:[%s191_s6] sm:$0xff]  ;;  %v1224_v53 = vld [vmem:[%s1548_s1 + $0x1b8] sm:$0xff]   ;;  %v1226_v54 = vld [vmem:[%s1548_s1 + $0x1f0] sm:$0xff]  }
  0x19   : > { %1103 = vmatprep.subr.bf16.mxu1 %v1201_v13  ;;  %v330_v39 = vcombine.high %v199_v34, %v199_v34  ;;  %v337_v42 = vrot.slane %v199_v34, %v1428_v41  ;;  %v1227_v56 = vld [vmem:[%s1548_s1 + $0x130] sm:$0xff]   ;;  %v1229_v57 = vld [vmem:[%s1548_s1 + $0x168] sm:$0xff]   ;;  %v1233_v61 = vld [vmem:[%s1548_s1 + $0x160] sm:$0xff]  }
  0x1a   : > { %v1228_v58 = vld [vmem:[%s1548_s1 + $0x1b0] sm:$0xff]   ;;  %v1230_v59 = vld [vmem:[%s1548_s1 + $0x1e8] sm:$0xff]   ;;  %v1234_v63 = vld [vmem:[%s1548_s1 + $0x1e0] sm:$0xff]  }
  0x1b   : > { %1082 = vmatpush3.bf16.msra.mxu0 %v1202_v14  ;;  %v1432_v43 = vrot.slane %v330_v39, %v1428_v41  ;;  %v345_v44 = vcombine.high %v337_v42, %v337_v42  ;;  %v353_v45 = vrot.slane %v337_v42, %v1428_v41  ;;  %v1231_v60 = vld [vmem:[%s1548_s1 + $0x128] sm:$0xff]   ;;  %v1235_v0 = vld [vmem:[%s1548_s1 + $0x120] sm:$0xff]   ;;  %v1237_v1 = vld [vmem:[%s1548_s1 + $0x158] sm:$0xff]  }
  0x1c   : > { %1104 = vmatpush3.bf16.msra.mxu1 %v1203_v15  ;;  %1083 = vmatprep.subr.bf16.mxu0 %v1204_v16  ;;  %v1232_v62 = vld [vmem:[%s1548_s1 + $0x1a8] sm:$0xff]   ;;  %v1236_v2 = vld [vmem:[%s1548_s1 + $0x1a0] sm:$0xff]   ;;  %v1238_v3 = vld [vmem:[%s1548_s1 + $0x1d8] sm:$0xff]  }
  0x1d   : > { %1105 = vmatprep.subr.bf16.mxu1 %v1205_v17  ;;  %v346_v46 = vcombine.high %v1432_v43, %v1432_v43  ;;  %v367_v47 = vrot.slane %v345_v44, %v1428_v41  ;;  %v375_v50 = vcombine.high %v353_v45, %v353_v45  ;;  %v1239_v4 = vld [vmem:[%s1548_s1 + $0x118] sm:$0xff]   ;;  %v1241_v5 = vld [vmem:[%s1548_s1 + $0x150] sm:$0xff]   ;;  %v1245_v9 = vld [vmem:[%s1548_s1 + $0x148] sm:$0xff]   ;;  %v360_v17 = vrot.slane %v1432_v43, %v1428_v41 }
  0x1e   : > { %v1240_v6 = vld [vmem:[%s1548_s1 + $0x198] sm:$0xff]   ;;  %v1242_v7 = vld [vmem:[%s1548_s1 + $0x1d0] sm:$0xff]   ;;  %v1246_v11 = vld [vmem:[%s1548_s1 + $0x1c8] sm:$0xff]  }
  0x1f   : > { %1084 = vmatpush3.bf16.msra.mxu0 %v1206_v18  ;;  %v374_v49 = vrot.slane %v346_v46, %v1428_v41  ;;  %803 = vmatprep.mubr.bf16.mxu0 %v367_v47  ;;  %v377_v52 = vcombine.high %v367_v47, %v367_v47  ;;  %v1243_v8 = vld [vmem:[%s1548_s1 + $0x110] sm:$0xff]   ;;  %v1247_v12 = vld [vmem:[%s1548_s1 + $0x108] sm:$0xff]   ;;  %v1249_v13 = vld [vmem:[%s1548_s1 + $0x140] sm:$0xff]  }
  0x20   : > { %1106 = vmatpush3.bf16.msra.mxu1 %v1207_v19  ;;  %1085 = vmatprep.subr.bf16.mxu0 %v1208_v20  ;;  %v1244_v10 = vld [vmem:[%s1548_s1 + $0x190] sm:$0xff]   ;;  %v1248_v14 = vld [vmem:[%s1548_s1 + $0x188] sm:$0xff]   ;;  %v1250_v15 = vld [vmem:[%s1548_s1 + $0x1c0] sm:$0xff]   ;;  %v376_v19 = vcombine.high %v360_v17, %v360_v17 }
  0x21   : > { %1107 = vmatprep.subr.bf16.mxu1 %v1209_v21  ;;  %v378_v55 = vcombine.high %v374_v49, %v374_v49  ;;  %843 = vmatprep.mubr.bf16.mxu1 %v377_v52  ;;  %v1251_v16 = vld [vmem:[%s1548_s1 + $0x100] sm:$0xff]  }
  0x22   : > { %v1252_v18 = vld [vmem:[%s1548_s1 + $0x180] sm:$0xff]  }
  0x23   : > { %1086 = vmatpush3.bf16.msra.mxu0 %v1210_v22 }
  0x24   : > { %1108 = vmatpush3.bf16.msra.mxu1 %v1211_v23  ;;  %1087 = vmatprep.subr.bf16.mxu0 %v1212_v24 }
  0x25   : > { %1109 = vmatprep.subr.bf16.mxu1 %v1213_v25 }
  0x27   : > { %1088 = vmatpush3.bf16.msra.mxu0 %v1214_v26 }
  0x28   : > { %1110 = vmatpush3.bf16.msra.mxu1 %v1215_v27  ;;  %1089 = vmatprep.subr.bf16.mxu0 %v1216_v29  ;;  %v328_v29 = vld [vmem:[%s1549_s2] sm:$0x1] }
  0x29   : > { %1111 = vmatprep.subr.bf16.mxu1 %v1217_v30 }
  0x2b   : > { %1090 = vmatpush3.bf16.msra.mxu0 %v1218_v31 }
  0x2c   : > { %1112 = vmatpush3.bf16.msra.mxu1 %v1219_v32  ;;  %1119 = vmatprep.subr.bf16.mxu0 %v1221_v35 }
  0x2d   : > { %1141 = vmatprep.subr.bf16.mxu1 %v1222_v38 }
  0x2e   : > { %804 = vmatmul.mubr.bf16.vlgmr.msra.gmra.mxu0 %v353_v45 }
  0x2f   : > { %1120 = vmatpush3.bf16.msra.mxu0 %v1223_v48  ;;  %844 = vmatmul.mubr.bf16.vlgmr.msra.gmra.mxu1 %v375_v50 }
  0x30   : > { %1121 = vmatprep.subr.bf16.mxu0 %v1225_v51  ;;  %1142 = vmatpush3.bf16.msra.mxu1 %v1224_v53 }
  0x31   : > { %883 = vmatprep.mubr.bf16.mxu0 %v374_v49  ;;  %1143 = vmatprep.subr.bf16.mxu1 %v1226_v54 }
  0x32   : > { %923 = vmatprep.mubr.bf16.mxu1 %v378_v55 }
  0x33   : > { %1122 = vmatpush3.bf16.msra.mxu0 %v1227_v56 }
  0x34   : > { %1123 = vmatprep.subr.bf16.mxu0 %v1229_v57  ;;  %1144 = vmatpush3.bf16.msra.mxu1 %v1228_v58 }
  0x35   : > { %1145 = vmatprep.subr.bf16.mxu1 %v1230_v59 }
  0x37   : > { %1124 = vmatpush3.bf16.msra.mxu0 %v1231_v60 }
  0x38   : > { %1125 = vmatprep.subr.bf16.mxu0 %v1233_v61  ;;  %1146 = vmatpush3.bf16.msra.mxu1 %v1232_v62 }
  0x39   : > { %1147 = vmatprep.subr.bf16.mxu1 %v1234_v63 }
  0x3b   : > { %1126 = vmatpush3.bf16.msra.mxu0 %v1235_v0 }
  0x3c   : > { %1127 = vmatprep.subr.bf16.mxu0 %v1237_v1  ;;  %1148 = vmatpush3.bf16.msra.mxu1 %v1236_v2 }
  0x3d   : > { %1149 = vmatprep.subr.bf16.mxu1 %v1238_v3 }
  0x3f   : > { %1128 = vmatpush3.bf16.msra.mxu0 %v1239_v4 }
  0x40   : > { %1129 = vmatprep.subr.bf16.mxu0 %v1241_v5  ;;  %1150 = vmatpush3.bf16.msra.mxu1 %v1240_v6 }
  0x41   : > { %1151 = vmatprep.subr.bf16.mxu1 %v1242_v7 }
  0x43   : > { %1130 = vmatpush3.bf16.msra.mxu0 %v1243_v8 }
  0x44   : > { %1131 = vmatprep.subr.bf16.mxu0 %v1245_v9  ;;  %1152 = vmatpush3.bf16.msra.mxu1 %v1244_v10 }
  0x45   : > { %1153 = vmatprep.subr.bf16.mxu1 %v1246_v11 }
  0x47   : > { %1132 = vmatpush3.bf16.msra.mxu0 %v1247_v12 }
  0x48   : > { %1133 = vmatprep.subr.bf16.mxu0 %v1249_v13  ;;  %1154 = vmatpush3.bf16.msra.mxu1 %v1248_v14 }
  0x49   : > { %1155 = vmatprep.subr.bf16.mxu1 %v1250_v15 }
  0x4b   : > { %1134 = vmatpush3.bf16.msra.mxu0 %v1251_v16 }
  0x4c   : > { %1156 = vmatpush3.bf16.msra.mxu1 %v1252_v18 }
  0x4e   : > { %884 = vmatmul.mubr.bf16.vlgmr.msra.gmra.mxu0 %v360_v17 }
  0x4f   : > { %924 = vmatmul.mubr.bf16.vlgmr.msra.gmra.mxu1 %v376_v19 }
  0xee   : > { %v1091_v20 = vpop.f32.mrf.mxu0 }
  0xef   : > { %v1113_v21 = vpop.f32.mrf.mxu1 }
  0xf0   : > { %v1092_v22 = vpop.f32.mrf.mxu0 }
  0xf1   : > { %v1114_v23 = vpop.f32.mrf.mxu1  ;;  %v1093_v28 = vadd.f32 %v1092_v22, %v1091_v20 }
  0xf2   : > { %v1094_v24 = vpop.f32.mrf.mxu0  ;;  %v1115_v31 = vadd.f32 %v1114_v23, %v1113_v21 }
  0xf3   : > { %v1116_v25 = vpop.f32.mrf.mxu1  ;;  %v806_v30 = vadd.f32 %v1093_v28, %v328_v29 }
  0xf4   : > { %v1095_v26 = vpop.f32.mrf.mxu0 }
  0xf5   : > { %v1117_v27 = vpop.f32.mrf.mxu1  ;;  %v846_v35 = vadd.f32 %v1115_v31, %v806_v30 }
 0x10e   : > { %v1135_v32 = vpop.f32.mrf.mxu0 }
 0x10f   : > { %v1157_v33 = vpop.f32.mrf.mxu1 }
 0x110   : > { %v1136_v34 = vpop.f32.mrf.mxu0 }
 0x111   : > { %v1137_v36 = vadd.f32 %v1136_v34, %v1135_v32  ;;  %v1158_v37 = vpop.f32.mrf.mxu1 }
 0x112   : > { %v1138_v38 = vpop.f32.mrf.mxu0  ;;  %v1159_v40 = vadd.f32 %v1158_v37, %v1157_v33 }
 0x113   : > { %v886_v39 = vadd.f32 %v1137_v36, %v846_v35  ;;  %v1160_v41 = vpop.f32.mrf.mxu1 }
 0x114   : > { %v1139_v42 = vpop.f32.mrf.mxu0 }
 0x115   : > { %v926_v43 = vadd.f32 %v1159_v40, %v886_v39  ;;  %v1161_v44 = vpop.f32.mrf.mxu1 }
 0x117   : > { %931 = vst [vmem:[%s197_s10] sm:$0x1] %v926_v43 }
 0x118 PF: > { %s13_s14 = sadd.s32 1, %s1275_s14   ;;  %s1551_s12 = smov %s1271_s13 }
 0x119   : > { %p10_p5 = scmp.ge.s32.totalorder %s13_s14, 4   ;;  %s1552_s13 = smov %s1554_s15 }
 0x11b   :  { %12 = sbr.rel (!%p10_p5) target bundleno = 2 (0x2), region = 62 }

</bundles_post_ra>
